<compile_context>
chip_gen: v7x
topology: tpu7x:2x2x1
jax: 0.10.0
libtpu: 0.0.40
codegen_flags: <defaults>
</compile_context>

<pallas_src>
import functools

import jax
import jax.numpy as jnp
from jax.experimental import pallas as pl
from jax.experimental.pallas import tpu as pltpu


def _softplus(x):
    # matches torch.nn.functional.softplus (beta=1, threshold=20)
    return jnp.where(x > 20.0, x, jnp.log1p(jnp.exp(jnp.minimum(x, 20.0))))


def gru_recurrent_kernel(gi_ref, whh_ref, bhh_ref, h_out_ref, h_state,
                         *, t_chunk, hidden):
    """Sequential GRU recurrence over one chunk of `t_chunk` timesteps.

    gi_ref    : (t_chunk, B, 3H)  precomputed x_t @ W_ih^T + b_ih (time-major)
    whh_ref   : (H, 3H)           W_hh^T
    bhh_ref   : (1, 3H)           b_hh
    h_out_ref : (t_chunk, B, H)   per-step hidden states (lane-dense, H % 128 == 0)
    h_state   : (B, H) VMEM scratch carrying h across grid chunks
    """
    @pl.when(pl.program_id(0) == 0)
    def _():
        h_state[...] = jnp.zeros_like(h_state)

    bhh = bhh_ref[...]  # (1, 3H): tiny, keep resident across the loop

    def step(t, h):
        gi = gi_ref[t]  # (B, 3H) — input projection already done outside
        # the only matmul that must remain on the serial critical path
        gh = jnp.dot(h, whh_ref[...], preferred_element_type=jnp.float32) + bhh

        i_r = gi[:, :hidden]
        i_z = gi[:, hidden:2 * hidden]
        i_n = gi[:, 2 * hidden:]
        h_r = gh[:, :hidden]
        h_z = gh[:, hidden:2 * hidden]
        h_n = gh[:, 2 * hidden:]

        r = jax.nn.sigmoid(i_r + h_r)
        z = jax.nn.sigmoid(i_z + h_z)
        n = jnp.tanh(i_n + r * h_n)
        h_new = (1.0 - z) * n + z * h

        h_out_ref[t] = h_new.astype(h_out_ref.dtype)
        return h_new

    # short fixed trip count -> unroll so the LLO scheduler sees the whole chunk
    h_final = jax.lax.fori_loop(0, t_chunk, step, h_state[...], unroll=True)
    h_state[...] = h_final


def gru_model_forward(x, params, *, t_chunk=None):
    """x: (B, T, D_in) float32  ->  (B, T, D_out) float32 (GRUModel.forward)."""
    B, T, _ = x.shape
    wih_t, whh_t, bih, bhh, wl_t, bl = params
    H = whh_t.shape[0]
    D_out = wl_t.shape[1]

    if t_chunk is None:
        t_chunk = min(T, 128)       # chunk size; keeps the gi/h chunks VMEM-friendly
    assert T % t_chunk == 0, "T must be divisible by t_chunk"

    hp = jax.lax.Precision.HIGHEST

    # (1) Input projection for ALL timesteps at once: one (B*T, D_in) x (D_in, 3H)
    #     matmul instead of T tiny M=B matmuls on the serial path; b_ih folded in.
    gi = jnp.einsum("btd,dg->btg", x, wih_t, precision=hp) + bih[0]
    gi_tm = jnp.transpose(gi, (1, 0, 2))            # (T, B, 3H), time-major

    kernel = functools.partial(gru_recurrent_kernel, t_chunk=t_chunk, hidden=H)

    hs_tm = pl.pallas_call(
        kernel,
        out_shape=jax.ShapeDtypeStruct((T, B, H), jnp.float32),
        grid_spec=pltpu.PrefetchScalarGridSpec(
            num_scalar_prefetch=0,
            grid=(T // t_chunk,),
            in_specs=[
                pl.BlockSpec((t_chunk, B, 3 * H), lambda c: (c, 0, 0)),  # gi chunk
                pl.BlockSpec((H, 3 * H), lambda c: (0, 0)),              # W_hh^T
                pl.BlockSpec((1, 3 * H), lambda c: (0, 0)),              # b_hh
            ],
            out_specs=pl.BlockSpec((t_chunk, B, H), lambda c: (c, 0, 0)),  # h states
            scratch_shapes=[pltpu.VMEM((B, H), jnp.float32)],             # h carry
        ),
        compiler_params=pltpu.CompilerParams(
            dimension_semantics=("arbitrary",),   # recurrence over time chunks
        ),
    )(gi_tm, whh_t, bhh)

    hs = jnp.transpose(hs_tm, (1, 0, 2))            # (B, T, H)

    # (2) Output head hoisted out of the recurrence: one (B*T, H) x (H, D_out)
    #     matmul; softplus only on the last-3-column slice (no full-width mask).
    y = jnp.einsum("bth,hd->btd", hs, wl_t, precision=hp) + bl[0]
    y = jnp.concatenate([y[..., :D_out - 3], _softplus(y[..., D_out - 3:])], axis=-1)
    return y


def reference_forward(x, params):
    """Pure-JAX reference matching PyTorch nn.GRU + Linear + softplus semantics."""
    wih_t, whh_t, bih, bhh, wl_t, bl = params
    B, T, _ = x.shape
    H = whh_t.shape[0]
    D_out = wl_t.shape[1]
    hp = jax.lax.Precision.HIGHEST

    def step(h, x_t):
        gi = jnp.dot(x_t, wih_t, precision=hp) + bih[0]
        gh = jnp.dot(h, whh_t, precision=hp) + bhh[0]
        i_r, i_z, i_n = gi[:, :H], gi[:, H:2 * H], gi[:, 2 * H:]
        h_r, h_z, h_n = gh[:, :H], gh[:, H:2 * H], gh[:, 2 * H:]
        r = jax.nn.sigmoid(i_r + h_r)
        z = jax.nn.sigmoid(i_z + h_z)
        n = jnp.tanh(i_n + r * h_n)
        h_new = (1.0 - z) * n + z * h
        return h_new, h_new

    h0 = jnp.zeros((B, H), jnp.float32)
    _, hs = jax.lax.scan(step, h0, jnp.transpose(x, (1, 0, 2)))
    hs = jnp.transpose(hs, (1, 0, 2))                       # (B, T, H)
    y = jnp.einsum("bth,hd->btd", hs, wl_t, precision=hp) + bl[0]
    col = jnp.arange(D_out)
    return jnp.where(col >= D_out - 3, _softplus(y), y)


def make_params(key, d_in, d_out, hidden):
    k = jax.random.split(key, 6)
    s = 1.0 / jnp.sqrt(hidden)
    # stored already transposed: (D_in, 3H), (H, 3H), (H, D_out)
    wih_t = jax.random.uniform(k[0], (d_in, 3 * hidden), jnp.float32, -s, s)
    whh_t = jax.random.uniform(k[1], (hidden, 3 * hidden), jnp.float32, -s, s)
    bih = jax.random.uniform(k[2], (1, 3 * hidden), jnp.float32, -s, s)
    bhh = jax.random.uniform(k[3], (1, 3 * hidden), jnp.float32, -s, s)
    wl_t = jax.random.uniform(k[4], (hidden, d_out), jnp.float32, -s, s)
    bl = jax.random.uniform(k[5], (1, d_out), jnp.float32, -s, s)
    return (wih_t, whh_t, bih, bhh, wl_t, bl)


if __name__ == "__main__":
    # Small TPU-friendly shapes consistent with the module (D_in=3, D_out=6).
    # D_Hidden reduced from 725 -> 128 for a clean lane-aligned demo size.
    B, T, D_IN, D_OUT, D_HIDDEN = 2, 8, 3, 6, 128

    key = jax.random.PRNGKey(0)
    kx, kp = jax.random.split(key)
    x = jax.random.normal(kx, (B, T, D_IN), jnp.float32)
    params = make_params(kp, D_IN, D_OUT, D_HIDDEN)

    out = jax.block_until_ready(gru_model_forward(x, params))
    ref = jax.block_until_ready(reference_forward(x, params))

    assert out.shape == (B, T, D_OUT)
    assert jnp.allclose(out, ref, atol=1e-5, rtol=1e-5), (
        float(jnp.max(jnp.abs(out - ref))))

    print("KERNEL_OK")
</pallas_src>

<mosaic_0001>
module attributes {stable_mosaic.version = 11 : i64} {
  func.func @gru_recurrent_kernel(%arg0: i32, %arg1: memref<8x2x384xf32, #tpu.memory_space<vmem>>, %arg2: memref<128x384xf32, #tpu.memory_space<vmem>>, %arg3: memref<1x384xf32, #tpu.memory_space<vmem>>, %arg4: memref<8x2x128xf32, #tpu.memory_space<vmem>>, %arg5: memref<2x128xf32, #tpu.memory_space<vmem>>) attributes {dimension_semantics = [#tpu.dimension_semantics<arbitrary>], iteration_bounds = array<i64: 1>, scalar_prefetch = 0 : i64, scratch_operands = 1 : i64, tpu.core_type = #tpu.core_type<tc>, window_params = [{transform_indices = @transform_0, window_bounds = array<i64: 8, 2, 384>}, {pipeline_mode = #tpu.pipeline_mode<synchronous>, transform_indices = @transform_1, window_bounds = array<i64: 128, 384>}, {pipeline_mode = #tpu.pipeline_mode<synchronous>, transform_indices = @transform_2, window_bounds = array<i64: 1, 384>}, {transform_indices = @transform_3, window_bounds = array<i64: 8, 2, 128>}]} {
    %c0_i32 = arith.constant 0 : i32
    %0 = arith.cmpi eq, %arg0, %c0_i32 : i32
    %1 = arith.extui %0 : i1 to i32
    %c0_i32_0 = arith.constant 0 : i32
    %2 = arith.cmpi ne, %1, %c0_i32_0 : i32
    scf.if %2 {
      %cst_86 = arith.constant 0.000000e+00 : f32
      %302 = vector.broadcast %cst_86 : f32 to vector<2x128xf32>
      %c0_87 = arith.constant 0 : index
      %c0_88 = arith.constant 0 : index
      %303 = vector.load %arg5[%c0_87, %c0_88] : memref<2x128xf32, #tpu.memory_space<vmem>>, vector<2x128xf32>
      tpu.vector_store %arg5[%c0_87, %c0_88], %302 {strides = array<i32>} : memref<2x128xf32, #tpu.memory_space<vmem>>, vector<2x128xf32>,
    } else {
    }
    %c0 = arith.constant 0 : index
    %c0_1 = arith.constant 0 : index
    %3 = vector.load %arg3[%c0, %c0_1] : memref<1x384xf32, #tpu.memory_space<vmem>>, vector<1x384xf32>
    %c0_2 = arith.constant 0 : index
    %c0_3 = arith.constant 0 : index
    %4 = vector.load %arg5[%c0_2, %c0_3] : memref<2x128xf32, #tpu.memory_space<vmem>>, vector<2x128xf32>
    %c0_i32_4 = arith.constant 0 : i32
    %5 = arith.index_cast %c0_i32_4 : i32 to index
    %c0_5 = arith.constant 0 : index
    %c0_6 = arith.constant 0 : index
    %6 = vector.load %arg1[%5, %c0_5, %c0_6] : memref<8x2x384xf32, #tpu.memory_space<vmem>>, vector<1x2x384xf32>
    %7 = vector.shape_cast %6 : vector<1x2x384xf32> to vector<2x384xf32>
    %c0_7 = arith.constant 0 : index
    %c0_8 = arith.constant 0 : index
    %8 = vector.load %arg2[%c0_7, %c0_8] : memref<128x384xf32, #tpu.memory_space<vmem>>, vector<128x384xf32>
    %cst = arith.constant dense<0.000000e+00> : vector<2x384xf32>
    %9 = tpu.matmul %4, %8, %cst {dimension_numbers = #tpu.dot_dimension_numbers<[1], [0], [0], [1], [0, 0, 1, 1], [], []>} : vector<2x128xf32>, vector<128x384xf32>, vector<2x384xf32> -> vector<2x384xf32>
    %10 = vector.broadcast %3 : vector<1x384xf32> to vector<2x384xf32>
    %11 = arith.addf %9, %10 : vector<2x384xf32>
    %12 = vector.extract_strided_slice %7 {offsets = [0, 0], sizes = [2, 128], strides = [1, 1]} : vector<2x384xf32> to vector<2x128xf32>
    %13 = vector.extract_strided_slice %7 {offsets = [0, 128], sizes = [2, 128], strides = [1, 1]} : vector<2x384xf32> to vector<2x128xf32>
    %14 = vector.extract_strided_slice %7 {offsets = [0, 256], sizes = [2, 128], strides = [1, 1]} : vector<2x384xf32> to vector<2x128xf32>
    %15 = vector.extract_strided_slice %11 {offsets = [0, 0], sizes = [2, 128], strides = [1, 1]} : vector<2x384xf32> to vector<2x128xf32>
    %16 = vector.extract_strided_slice %11 {offsets = [0, 128], sizes = [2, 128], strides = [1, 1]} : vector<2x384xf32> to vector<2x128xf32>
    %17 = vector.extract_strided_slice %11 {offsets = [0, 256], sizes = [2, 128], strides = [1, 1]} : vector<2x384xf32> to vector<2x128xf32>
    %18 = arith.addf %12, %15 : vector<2x128xf32>
    %19 = arith.negf %18 : vector<2x128xf32>
    %20 = math.exp %19 : vector<2x128xf32>
    %cst_9 = arith.constant 1.000000e+00 : f32
    %21 = vector.broadcast %cst_9 : f32 to vector<2x128xf32>
    %22 = arith.addf %21, %20 : vector<2x128xf32>
    %23 = arith.divf %21, %22 : vector<2x128xf32>
    %24 = arith.addf %13, %16 : vector<2x128xf32>
    %25 = arith.negf %24 : vector<2x128xf32>
    %26 = math.exp %25 : vector<2x128xf32>
    %cst_10 = arith.constant 1.000000e+00 : f32
    %27 = vector.broadcast %cst_10 : f32 to vector<2x128xf32>
    %28 = arith.addf %27, %26 : vector<2x128xf32>
    %29 = arith.divf %27, %28 : vector<2x128xf32>
    %30 = arith.mulf %23, %17 : vector<2x128xf32>
    %31 = arith.addf %14, %30 : vector<2x128xf32>
    %32 = math.tanh %31 : vector<2x128xf32>
    %cst_11 = arith.constant 1.000000e+00 : f32
    %33 = vector.broadcast %cst_11 : f32 to vector<2x128xf32>
    %34 = arith.subf %33, %29 : vector<2x128xf32>
    %35 = arith.mulf %34, %32 : vector<2x128xf32>
    %36 = arith.mulf %29, %4 : vector<2x128xf32>
    %37 = arith.addf %35, %36 : vector<2x128xf32>
    %38 = arith.index_cast %c0_i32_4 : i32 to index
    %c0_12 = arith.constant 0 : index
    %c0_13 = arith.constant 0 : index
    %39 = vector.load %arg4[%38, %c0_12, %c0_13] : memref<8x2x128xf32, #tpu.memory_space<vmem>>, vector<1x2x128xf32>
    %40 = vector.shape_cast %39 : vector<1x2x128xf32> to vector<2x128xf32>
    %41 = vector.shape_cast %37 : vector<2x128xf32> to vector<1x2x128xf32>
    tpu.vector_store %arg4[%38, %c0_12, %c0_13], %41 {strides = array<i32>} : memref<8x2x128xf32, #tpu.memory_space<vmem>>, vector<1x2x128xf32>,
    %c1_i32 = arith.constant 1 : i32
    %42 = arith.index_cast %c1_i32 : i32 to index
    %c0_14 = arith.constant 0 : index
    %c0_15 = arith.constant 0 : index
    %43 = vector.load %arg1[%42, %c0_14, %c0_15] : memref<8x2x384xf32, #tpu.memory_space<vmem>>, vector<1x2x384xf32>
    %44 = vector.shape_cast %43 : vector<1x2x384xf32> to vector<2x384xf32>
    %c0_16 = arith.constant 0 : index
    %c0_17 = arith.constant 0 : index
    %45 = vector.load %arg2[%c0_16, %c0_17] : memref<128x384xf32, #tpu.memory_space<vmem>>, vector<128x384xf32>
    %cst_18 = arith.constant dense<0.000000e+00> : vector<2x384xf32>
    %46 = tpu.matmul %37, %45, %cst_18 {dimension_numbers = #tpu.dot_dimension_numbers<[1], [0], [0], [1], [0, 0, 1, 1], [], []>} : vector<2x128xf32>, vector<128x384xf32>, vector<2x384xf32> -> vector<2x384xf32>
    %47 = vector.broadcast %3 : vector<1x384xf32> to vector<2x384xf32>
    %48 = arith.addf %46, %47 : vector<2x384xf32>
    %49 = vector.extract_strided_slice %44 {offsets = [0, 0], sizes = [2, 128], strides = [1, 1]} : vector<2x384xf32> to vector<2x128xf32>
    %50 = vector.extract_strided_slice %44 {offsets = [0, 128], sizes = [2, 128], strides = [1, 1]} : vector<2x384xf32> to vector<2x128xf32>
    %51 = vector.extract_strided_slice %44 {offsets = [0, 256], sizes = [2, 128], strides = [1, 1]} : vector<2x384xf32> to vector<2x128xf32>
    %52 = vector.extract_strided_slice %48 {offsets = [0, 0], sizes = [2, 128], strides = [1, 1]} : vector<2x384xf32> to vector<2x128xf32>
    %53 = vector.extract_strided_slice %48 {offsets = [0, 128], sizes = [2, 128], strides = [1, 1]} : vector<2x384xf32> to vector<2x128xf32>
    %54 = vector.extract_strided_slice %48 {offsets = [0, 256], sizes = [2, 128], strides = [1, 1]} : vector<2x384xf32> to vector<2x128xf32>
    %55 = arith.addf %49, %52 : vector<2x128xf32>
    %56 = arith.negf %55 : vector<2x128xf32>
    %57 = math.exp %56 : vector<2x128xf32>
    %cst_19 = arith.constant 1.000000e+00 : f32
    %58 = vector.broadcast %cst_19 : f32 to vector<2x128xf32>
    %59 = arith.addf %58, %57 : vector<2x128xf32>
    %60 = arith.divf %58, %59 : vector<2x128xf32>
    %61 = arith.addf %50, %53 : vector<2x128xf32>
    %62 = arith.negf %61 : vector<2x128xf32>
    %63 = math.exp %62 : vector<2x128xf32>
    %cst_20 = arith.constant 1.000000e+00 : f32
    %64 = vector.broadcast %cst_20 : f32 to vector<2x128xf32>
    %65 = arith.addf %64, %63 : vector<2x128xf32>
    %66 = arith.divf %64, %65 : vector<2x128xf32>
    %67 = arith.mulf %60, %54 : vector<2x128xf32>
    %68 = arith.addf %51, %67 : vector<2x128xf32>
    %69 = math.tanh %68 : vector<2x128xf32>
    %cst_21 = arith.constant 1.000000e+00 : f32
    %70 = vector.broadcast %cst_21 : f32 to vector<2x128xf32>
    %71 = arith.subf %70, %66 : vector<2x128xf32>
    %72 = arith.mulf %71, %69 : vector<2x128xf32>
    %73 = arith.mulf %66, %37 : vector<2x128xf32>
    %74 = arith.addf %72, %73 : vector<2x128xf32>
    %75 = arith.index_cast %c1_i32 : i32 to index
    %c0_22 = arith.constant 0 : index
    %c0_23 = arith.constant 0 : index
    %76 = vector.load %arg4[%75, %c0_22, %c0_23] : memref<8x2x128xf32, #tpu.memory_space<vmem>>, vector<1x2x128xf32>
    %77 = vector.shape_cast %76 : vector<1x2x128xf32> to vector<2x128xf32>
    %78 = vector.shape_cast %74 : vector<2x128xf32> to vector<1x2x128xf32>
    tpu.vector_store %arg4[%75, %c0_22, %c0_23], %78 {strides = array<i32>} : memref<8x2x128xf32, #tpu.memory_space<vmem>>, vector<1x2x128xf32>,
    %c2_i32 = arith.constant 2 : i32
    %79 = arith.index_cast %c2_i32 : i32 to index
    %c0_24 = arith.constant 0 : index
    %c0_25 = arith.constant 0 : index
    %80 = vector.load %arg1[%79, %c0_24, %c0_25] : memref<8x2x384xf32, #tpu.memory_space<vmem>>, vector<1x2x384xf32>
    %81 = vector.shape_cast %80 : vector<1x2x384xf32> to vector<2x384xf32>
    %c0_26 = arith.constant 0 : index
    %c0_27 = arith.constant 0 : index
    %82 = vector.load %arg2[%c0_26, %c0_27] : memref<128x384xf32, #tpu.memory_space<vmem>>, vector<128x384xf32>
    %cst_28 = arith.constant dense<0.000000e+00> : vector<2x384xf32>
    %83 = tpu.matmul %74, %82, %cst_28 {dimension_numbers = #tpu.dot_dimension_numbers<[1], [0], [0], [1], [0, 0, 1, 1], [], []>} : vector<2x128xf32>, vector<128x384xf32>, vector<2x384xf32> -> vector<2x384xf32>
    %84 = vector.broadcast %3 : vector<1x384xf32> to vector<2x384xf32>
    %85 = arith.addf %83, %84 : vector<2x384xf32>
    %86 = vector.extract_strided_slice %81 {offsets = [0, 0], sizes = [2, 128], strides = [1, 1]} : vector<2x384xf32> to vector<2x128xf32>
    %87 = vector.extract_strided_slice %81 {offsets = [0, 128], sizes = [2, 128], strides = [1, 1]} : vector<2x384xf32> to vector<2x128xf32>
    %88 = vector.extract_strided_slice %81 {offsets = [0, 256], sizes = [2, 128], strides = [1, 1]} : vector<2x384xf32> to vector<2x128xf32>
    %89 = vector.extract_strided_slice %85 {offsets = [0, 0], sizes = [2, 128], strides = [1, 1]} : vector<2x384xf32> to vector<2x128xf32>
    %90 = vector.extract_strided_slice %85 {offsets = [0, 128], sizes = [2, 128], strides = [1, 1]} : vector<2x384xf32> to vector<2x128xf32>
    %91 = vector.extract_strided_slice %85 {offsets = [0, 256], sizes = [2, 128], strides = [1, 1]} : vector<2x384xf32> to vector<2x128xf32>
    %92 = arith.addf %86, %89 : vector<2x128xf32>
    %93 = arith.negf %92 : vector<2x128xf32>
    %94 = math.exp %93 : vector<2x128xf32>
    %cst_29 = arith.constant 1.000000e+00 : f32
    %95 = vector.broadcast %cst_29 : f32 to vector<2x128xf32>
    %96 = arith.addf %95, %94 : vector<2x128xf32>
    %97 = arith.divf %95, %96 : vector<2x128xf32>
    %98 = arith.addf %87, %90 : vector<2x128xf32>
    %99 = arith.negf %98 : vector<2x128xf32>
    %100 = math.exp %99 : vector<2x128xf32>
    %cst_30 = arith.constant 1.000000e+00 : f32
    %101 = vector.broadcast %cst_30 : f32 to vector<2x128xf32>
    %102 = arith.addf %101, %100 : vector<2x128xf32>
    %103 = arith.divf %101, %102 : vector<2x128xf32>
    %104 = arith.mulf %97, %91 : vector<2x128xf32>
    %105 = arith.addf %88, %104 : vector<2x128xf32>
    %106 = math.tanh %105 : vector<2x128xf32>
    %cst_31 = arith.constant 1.000000e+00 : f32
    %107 = vector.broadcast %cst_31 : f32 to vector<2x128xf32>
    %108 = arith.subf %107, %103 : vector<2x128xf32>
    %109 = arith.mulf %108, %106 : vector<2x128xf32>
    %110 = arith.mulf %103, %74 : vector<2x128xf32>
    %111 = arith.addf %109, %110 : vector<2x128xf32>
    %112 = arith.index_cast %c2_i32 : i32 to index
    %c0_32 = arith.constant 0 : index
    %c0_33 = arith.constant 0 : index
    %113 = vector.load %arg4[%112, %c0_32, %c0_33] : memref<8x2x128xf32, #tpu.memory_space<vmem>>, vector<1x2x128xf32>
    %114 = vector.shape_cast %113 : vector<1x2x128xf32> to vector<2x128xf32>
    %115 = vector.shape_cast %111 : vector<2x128xf32> to vector<1x2x128xf32>
    tpu.vector_store %arg4[%112, %c0_32, %c0_33], %115 {strides = array<i32>} : memref<8x2x128xf32, #tpu.memory_space<vmem>>, vector<1x2x128xf32>,
    %c3_i32 = arith.constant 3 : i32
    %116 = arith.index_cast %c3_i32 : i32 to index
    %c0_34 = arith.constant 0 : index
    %c0_35 = arith.constant 0 : index
    %117 = vector.load %arg1[%116, %c0_34, %c0_35] : memref<8x2x384xf32, #tpu.memory_space<vmem>>, vector<1x2x384xf32>
    %118 = vector.shape_cast %117 : vector<1x2x384xf32> to vector<2x384xf32>
    %c0_36 = arith.constant 0 : index
    %c0_37 = arith.constant 0 : index
    %119 = vector.load %arg2[%c0_36, %c0_37] : memref<128x384xf32, #tpu.memory_space<vmem>>, vector<128x384xf32>
    %cst_38 = arith.constant dense<0.000000e+00> : vector<2x384xf32>
    %120 = tpu.matmul %111, %119, %cst_38 {dimension_numbers = #tpu.dot_dimension_numbers<[1], [0], [0], [1], [0, 0, 1, 1], [], []>} : vector<2x128xf32>, vector<128x384xf32>, vector<2x384xf32> -> vector<2x384xf32>
    %121 = vector.broadcast %3 : vector<1x384xf32> to vector<2x384xf32>
    %122 = arith.addf %120, %121 : vector<2x384xf32>
    %123 = vector.extract_strided_slice %118 {offsets = [0, 0], sizes = [2, 128], strides = [1, 1]} : vector<2x384xf32> to vector<2x128xf32>
    %124 = vector.extract_strided_slice %118 {offsets = [0, 128], sizes = [2, 128], strides = [1, 1]} : vector<2x384xf32> to vector<2x128xf32>
    %125 = vector.extract_strided_slice %118 {offsets = [0, 256], sizes = [2, 128], strides = [1, 1]} : vector<2x384xf32> to vector<2x128xf32>
    %126 = vector.extract_strided_slice %122 {offsets = [0, 0], sizes = [2, 128], strides = [1, 1]} : vector<2x384xf32> to vector<2x128xf32>
    %127 = vector.extract_strided_slice %122 {offsets = [0, 128], sizes = [2, 128], strides = [1, 1]} : vector<2x384xf32> to vector<2x128xf32>
    %128 = vector.extract_strided_slice %122 {offsets = [0, 256], sizes = [2, 128], strides = [1, 1]} : vector<2x384xf32> to vector<2x128xf32>
    %129 = arith.addf %123, %126 : vector<2x128xf32>
    %130 = arith.negf %129 : vector<2x128xf32>
    %131 = math.exp %130 : vector<2x128xf32>
    %cst_39 = arith.constant 1.000000e+00 : f32
    %132 = vector.broadcast %cst_39 : f32 to vector<2x128xf32>
    %133 = arith.addf %132, %131 : vector<2x128xf32>
    %134 = arith.divf %132, %133 : vector<2x128xf32>
    %135 = arith.addf %124, %127 : vector<2x128xf32>
    %136 = arith.negf %135 : vector<2x128xf32>
    %137 = math.exp %136 : vector<2x128xf32>
    %cst_40 = arith.constant 1.000000e+00 : f32
    %138 = vector.broadcast %cst_40 : f32 to vector<2x128xf32>
    %139 = arith.addf %138, %137 : vector<2x128xf32>
    %140 = arith.divf %138, %139 : vector<2x128xf32>
    %141 = arith.mulf %134, %128 : vector<2x128xf32>
    %142 = arith.addf %125, %141 : vector<2x128xf32>
    %143 = math.tanh %142 : vector<2x128xf32>
    %cst_41 = arith.constant 1.000000e+00 : f32
    %144 = vector.broadcast %cst_41 : f32 to vector<2x128xf32>
    %145 = arith.subf %144, %140 : vector<2x128xf32>
    %146 = arith.mulf %145, %143 : vector<2x128xf32>
    %147 = arith.mulf %140, %111 : vector<2x128xf32>
    %148 = arith.addf %146, %147 : vector<2x128xf32>
    %149 = arith.index_cast %c3_i32 : i32 to index
    %c0_42 = arith.constant 0 : index
    %c0_43 = arith.constant 0 : index
    %150 = vector.load %arg4[%149, %c0_42, %c0_43] : memref<8x2x128xf32, #tpu.memory_space<vmem>>, vector<1x2x128xf32>
    %151 = vector.shape_cast %150 : vector<1x2x128xf32> to vector<2x128xf32>
    %152 = vector.shape_cast %148 : vector<2x128xf32> to vector<1x2x128xf32>
    tpu.vector_store %arg4[%149, %c0_42, %c0_43], %152 {strides = array<i32>} : memref<8x2x128xf32, #tpu.memory_space<vmem>>, vector<1x2x128xf32>,
    %c4_i32 = arith.constant 4 : i32
    %153 = arith.index_cast %c4_i32 : i32 to index
    %c0_44 = arith.constant 0 : index
    %c0_45 = arith.constant 0 : index
    %154 = vector.load %arg1[%153, %c0_44, %c0_45] : memref<8x2x384xf32, #tpu.memory_space<vmem>>, vector<1x2x384xf32>
    %155 = vector.shape_cast %154 : vector<1x2x384xf32> to vector<2x384xf32>
    %c0_46 = arith.constant 0 : index
    %c0_47 = arith.constant 0 : index
    %156 = vector.load %arg2[%c0_46, %c0_47] : memref<128x384xf32, #tpu.memory_space<vmem>>, vector<128x384xf32>
    %cst_48 = arith.constant dense<0.000000e+00> : vector<2x384xf32>
    %157 = tpu.matmul %148, %156, %cst_48 {dimension_numbers = #tpu.dot_dimension_numbers<[1], [0], [0], [1], [0, 0, 1, 1], [], []>} : vector<2x128xf32>, vector<128x384xf32>, vector<2x384xf32> -> vector<2x384xf32>
    %158 = vector.broadcast %3 : vector<1x384xf32> to vector<2x384xf32>
    %159 = arith.addf %157, %158 : vector<2x384xf32>
    %160 = vector.extract_strided_slice %155 {offsets = [0, 0], sizes = [2, 128], strides = [1, 1]} : vector<2x384xf32> to vector<2x128xf32>
    %161 = vector.extract_strided_slice %155 {offsets = [0, 128], sizes = [2, 128], strides = [1, 1]} : vector<2x384xf32> to vector<2x128xf32>
    %162 = vector.extract_strided_slice %155 {offsets = [0, 256], sizes = [2, 128], strides = [1, 1]} : vector<2x384xf32> to vector<2x128xf32>
    %163 = vector.extract_strided_slice %159 {offsets = [0, 0], sizes = [2, 128], strides = [1, 1]} : vector<2x384xf32> to vector<2x128xf32>
    %164 = vector.extract_strided_slice %159 {offsets = [0, 128], sizes = [2, 128], strides = [1, 1]} : vector<2x384xf32> to vector<2x128xf32>
    %165 = vector.extract_strided_slice %159 {offsets = [0, 256], sizes = [2, 128], strides = [1, 1]} : vector<2x384xf32> to vector<2x128xf32>
    %166 = arith.addf %160, %163 : vector<2x128xf32>
    %167 = arith.negf %166 : vector<2x128xf32>
    %168 = math.exp %167 : vector<2x128xf32>
    %cst_49 = arith.constant 1.000000e+00 : f32
    %169 = vector.broadcast %cst_49 : f32 to vector<2x128xf32>
    %170 = arith.addf %169, %168 : vector<2x128xf32>
    %171 = arith.divf %169, %170 : vector<2x128xf32>
    %172 = arith.addf %161, %164 : vector<2x128xf32>
    %173 = arith.negf %172 : vector<2x128xf32>
    %174 = math.exp %173 : vector<2x128xf32>
    %cst_50 = arith.constant 1.000000e+00 : f32
    %175 = vector.broadcast %cst_50 : f32 to vector<2x128xf32>
    %176 = arith.addf %175, %174 : vector<2x128xf32>
    %177 = arith.divf %175, %176 : vector<2x128xf32>
    %178 = arith.mulf %171, %165 : vector<2x128xf32>
    %179 = arith.addf %162, %178 : vector<2x128xf32>
    %180 = math.tanh %179 : vector<2x128xf32>
    %cst_51 = arith.constant 1.000000e+00 : f32
    %181 = vector.broadcast %cst_51 : f32 to vector<2x128xf32>
    %182 = arith.subf %181, %177 : vector<2x128xf32>
    %183 = arith.mulf %182, %180 : vector<2x128xf32>
    %184 = arith.mulf %177, %148 : vector<2x128xf32>
    %185 = arith.addf %183, %184 : vector<2x128xf32>
    %186 = arith.index_cast %c4_i32 : i32 to index
    %c0_52 = arith.constant 0 : index
    %c0_53 = arith.constant 0 : index
    %187 = vector.load %arg4[%186, %c0_52, %c0_53] : memref<8x2x128xf32, #tpu.memory_space<vmem>>, vector<1x2x128xf32>
    %188 = vector.shape_cast %187 : vector<1x2x128xf32> to vector<2x128xf32>
    %189 = vector.shape_cast %185 : vector<2x128xf32> to vector<1x2x128xf32>
    tpu.vector_store %arg4[%186, %c0_52, %c0_53], %189 {strides = array<i32>} : memref<8x2x128xf32, #tpu.memory_space<vmem>>, vector<1x2x128xf32>,
    %c5_i32 = arith.constant 5 : i32
    %190 = arith.index_cast %c5_i32 : i32 to index
    %c0_54 = arith.constant 0 : index
    %c0_55 = arith.constant 0 : index
    %191 = vector.load %arg1[%190, %c0_54, %c0_55] : memref<8x2x384xf32, #tpu.memory_space<vmem>>, vector<1x2x384xf32>
    %192 = vector.shape_cast %191 : vector<1x2x384xf32> to vector<2x384xf32>
    %c0_56 = arith.constant 0 : index
    %c0_57 = arith.constant 0 : index
    %193 = vector.load %arg2[%c0_56, %c0_57] : memref<128x384xf32, #tpu.memory_space<vmem>>, vector<128x384xf32>
    %cst_58 = arith.constant dense<0.000000e+00> : vector<2x384xf32>
    %194 = tpu.matmul %185, %193, %cst_58 {dimension_numbers = #tpu.dot_dimension_numbers<[1], [0], [0], [1], [0, 0, 1, 1], [], []>} : vector<2x128xf32>, vector<128x384xf32>, vector<2x384xf32> -> vector<2x384xf32>
    %195 = vector.broadcast %3 : vector<1x384xf32> to vector<2x384xf32>
    %196 = arith.addf %194, %195 : vector<2x384xf32>
    %197 = vector.extract_strided_slice %192 {offsets = [0, 0], sizes = [2, 128], strides = [1, 1]} : vector<2x384xf32> to vector<2x128xf32>
    %198 = vector.extract_strided_slice %192 {offsets = [0, 128], sizes = [2, 128], strides = [1, 1]} : vector<2x384xf32> to vector<2x128xf32>
    %199 = vector.extract_strided_slice %192 {offsets = [0, 256], sizes = [2, 128], strides = [1, 1]} : vector<2x384xf32> to vector<2x128xf32>
    %200 = vector.extract_strided_slice %196 {offsets = [0, 0], sizes = [2, 128], strides = [1, 1]} : vector<2x384xf32> to vector<2x128xf32>
    %201 = vector.extract_strided_slice %196 {offsets = [0, 128], sizes = [2, 128], strides = [1, 1]} : vector<2x384xf32> to vector<2x128xf32>
    %202 = vector.extract_strided_slice %196 {offsets = [0, 256], sizes = [2, 128], strides = [1, 1]} : vector<2x384xf32> to vector<2x128xf32>
    %203 = arith.addf %197, %200 : vector<2x128xf32>
    %204 = arith.negf %203 : vector<2x128xf32>
    %205 = math.exp %204 : vector<2x128xf32>
    %cst_59 = arith.constant 1.000000e+00 : f32
    %206 = vector.broadcast %cst_59 : f32 to vector<2x128xf32>
    %207 = arith.addf %206, %205 : vector<2x128xf32>
    %208 = arith.divf %206, %207 : vector<2x128xf32>
    %209 = arith.addf %198, %201 : vector<2x128xf32>
    %210 = arith.negf %209 : vector<2x128xf32>
    %211 = math.exp %210 : vector<2x128xf32>
    %cst_60 = arith.constant 1.000000e+00 : f32
    %212 = vector.broadcast %cst_60 : f32 to vector<2x128xf32>
    %213 = arith.addf %212, %211 : vector<2x128xf32>
    %214 = arith.divf %212, %213 : vector<2x128xf32>
    %215 = arith.mulf %208, %202 : vector<2x128xf32>
    %216 = arith.addf %199, %215 : vector<2x128xf32>
    %217 = math.tanh %216 : vector<2x128xf32>
    %cst_61 = arith.constant 1.000000e+00 : f32
    %218 = vector.broadcast %cst_61 : f32 to vector<2x128xf32>
    %219 = arith.subf %218, %214 : vector<2x128xf32>
    %220 = arith.mulf %219, %217 : vector<2x128xf32>
    %221 = arith.mulf %214, %185 : vector<2x128xf32>
    %222 = arith.addf %220, %221 : vector<2x128xf32>
    %223 = arith.index_cast %c5_i32 : i32 to index
    %c0_62 = arith.constant 0 : index
    %c0_63 = arith.constant 0 : index
    %224 = vector.load %arg4[%223, %c0_62, %c0_63] : memref<8x2x128xf32, #tpu.memory_space<vmem>>, vector<1x2x128xf32>
    %225 = vector.shape_cast %224 : vector<1x2x128xf32> to vector<2x128xf32>
    %226 = vector.shape_cast %222 : vector<2x128xf32> to vector<1x2x128xf32>
    tpu.vector_store %arg4[%223, %c0_62, %c0_63], %226 {strides = array<i32>} : memref<8x2x128xf32, #tpu.memory_space<vmem>>, vector<1x2x128xf32>,
    %c6_i32 = arith.constant 6 : i32
    %227 = arith.index_cast %c6_i32 : i32 to index
    %c0_64 = arith.constant 0 : index
    %c0_65 = arith.constant 0 : index
    %228 = vector.load %arg1[%227, %c0_64, %c0_65] : memref<8x2x384xf32, #tpu.memory_space<vmem>>, vector<1x2x384xf32>
    %229 = vector.shape_cast %228 : vector<1x2x384xf32> to vector<2x384xf32>
    %c0_66 = arith.constant 0 : index
    %c0_67 = arith.constant 0 : index
    %230 = vector.load %arg2[%c0_66, %c0_67] : memref<128x384xf32, #tpu.memory_space<vmem>>, vector<128x384xf32>
    %cst_68 = arith.constant dense<0.000000e+00> : vector<2x384xf32>
    %231 = tpu.matmul %222, %230, %cst_68 {dimension_numbers = #tpu.dot_dimension_numbers<[1], [0], [0], [1], [0, 0, 1, 1], [], []>} : vector<2x128xf32>, vector<128x384xf32>, vector<2x384xf32> -> vector<2x384xf32>
    %232 = vector.broadcast %3 : vector<1x384xf32> to vector<2x384xf32>
    %233 = arith.addf %231, %232 : vector<2x384xf32>
    %234 = vector.extract_strided_slice %229 {offsets = [0, 0], sizes = [2, 128], strides = [1, 1]} : vector<2x384xf32> to vector<2x128xf32>
    %235 = vector.extract_strided_slice %229 {offsets = [0, 128], sizes = [2, 128], strides = [1, 1]} : vector<2x384xf32> to vector<2x128xf32>
    %236 = vector.extract_strided_slice %229 {offsets = [0, 256], sizes = [2, 128], strides = [1, 1]} : vector<2x384xf32> to vector<2x128xf32>
    %237 = vector.extract_strided_slice %233 {offsets = [0, 0], sizes = [2, 128], strides = [1, 1]} : vector<2x384xf32> to vector<2x128xf32>
    %238 = vector.extract_strided_slice %233 {offsets = [0, 128], sizes = [2, 128], strides = [1, 1]} : vector<2x384xf32> to vector<2x128xf32>
    %239 = vector.extract_strided_slice %233 {offsets = [0, 256], sizes = [2, 128], strides = [1, 1]} : vector<2x384xf32> to vector<2x128xf32>
    %240 = arith.addf %234, %237 : vector<2x128xf32>
    %241 = arith.negf %240 : vector<2x128xf32>
    %242 = math.exp %241 : vector<2x128xf32>
    %cst_69 = arith.constant 1.000000e+00 : f32
    %243 = vector.broadcast %cst_69 : f32 to vector<2x128xf32>
    %244 = arith.addf %243, %242 : vector<2x128xf32>
    %245 = arith.divf %243, %244 : vector<2x128xf32>
    %246 = arith.addf %235, %238 : vector<2x128xf32>
    %247 = arith.negf %246 : vector<2x128xf32>
    %248 = math.exp %247 : vector<2x128xf32>
    %cst_70 = arith.constant 1.000000e+00 : f32
    %249 = vector.broadcast %cst_70 : f32 to vector<2x128xf32>
    %250 = arith.addf %249, %248 : vector<2x128xf32>
    %251 = arith.divf %249, %250 : vector<2x128xf32>
    %252 = arith.mulf %245, %239 : vector<2x128xf32>
    %253 = arith.addf %236, %252 : vector<2x128xf32>
    %254 = math.tanh %253 : vector<2x128xf32>
    %cst_71 = arith.constant 1.000000e+00 : f32
    %255 = vector.broadcast %cst_71 : f32 to vector<2x128xf32>
    %256 = arith.subf %255, %251 : vector<2x128xf32>
    %257 = arith.mulf %256, %254 : vector<2x128xf32>
    %258 = arith.mulf %251, %222 : vector<2x128xf32>
    %259 = arith.addf %257, %258 : vector<2x128xf32>
    %260 = arith.index_cast %c6_i32 : i32 to index
    %c0_72 = arith.constant 0 : index
    %c0_73 = arith.constant 0 : index
    %261 = vector.load %arg4[%260, %c0_72, %c0_73] : memref<8x2x128xf32, #tpu.memory_space<vmem>>, vector<1x2x128xf32>
    %262 = vector.shape_cast %261 : vector<1x2x128xf32> to vector<2x128xf32>
    %263 = vector.shape_cast %259 : vector<2x128xf32> to vector<1x2x128xf32>
    tpu.vector_store %arg4[%260, %c0_72, %c0_73], %263 {strides = array<i32>} : memref<8x2x128xf32, #tpu.memory_space<vmem>>, vector<1x2x128xf32>,
    %c7_i32 = arith.constant 7 : i32
    %264 = arith.index_cast %c7_i32 : i32 to index
    %c0_74 = arith.constant 0 : index
    %c0_75 = arith.constant 0 : index
    %265 = vector.load %arg1[%264, %c0_74, %c0_75] : memref<8x2x384xf32, #tpu.memory_space<vmem>>, vector<1x2x384xf32>
    %266 = vector.shape_cast %265 : vector<1x2x384xf32> to vector<2x384xf32>
    %c0_76 = arith.constant 0 : index
    %c0_77 = arith.constant 0 : index
    %267 = vector.load %arg2[%c0_76, %c0_77] : memref<128x384xf32, #tpu.memory_space<vmem>>, vector<128x384xf32>
    %cst_78 = arith.constant dense<0.000000e+00> : vector<2x384xf32>
    %268 = tpu.matmul %259, %267, %cst_78 {dimension_numbers = #tpu.dot_dimension_numbers<[1], [0], [0], [1], [0, 0, 1, 1], [], []>} : vector<2x128xf32>, vector<128x384xf32>, vector<2x384xf32> -> vector<2x384xf32>
    %269 = vector.broadcast %3 : vector<1x384xf32> to vector<2x384xf32>
    %270 = arith.addf %268, %269 : vector<2x384xf32>
    %271 = vector.extract_strided_slice %266 {offsets = [0, 0], sizes = [2, 128], strides = [1, 1]} : vector<2x384xf32> to vector<2x128xf32>
    %272 = vector.extract_strided_slice %266 {offsets = [0, 128], sizes = [2, 128], strides = [1, 1]} : vector<2x384xf32> to vector<2x128xf32>
    %273 = vector.extract_strided_slice %266 {offsets = [0, 256], sizes = [2, 128], strides = [1, 1]} : vector<2x384xf32> to vector<2x128xf32>
    %274 = vector.extract_strided_slice %270 {offsets = [0, 0], sizes = [2, 128], strides = [1, 1]} : vector<2x384xf32> to vector<2x128xf32>
    %275 = vector.extract_strided_slice %270 {offsets = [0, 128], sizes = [2, 128], strides = [1, 1]} : vector<2x384xf32> to vector<2x128xf32>
    %276 = vector.extract_strided_slice %270 {offsets = [0, 256], sizes = [2, 128], strides = [1, 1]} : vector<2x384xf32> to vector<2x128xf32>
    %277 = arith.addf %271, %274 : vector<2x128xf32>
    %278 = arith.negf %277 : vector<2x128xf32>
    %279 = math.exp %278 : vector<2x128xf32>
    %cst_79 = arith.constant 1.000000e+00 : f32
    %280 = vector.broadcast %cst_79 : f32 to vector<2x128xf32>
    %281 = arith.addf %280, %279 : vector<2x128xf32>
    %282 = arith.divf %280, %281 : vector<2x128xf32>
    %283 = arith.addf %272, %275 : vector<2x128xf32>
    %284 = arith.negf %283 : vector<2x128xf32>
    %285 = math.exp %284 : vector<2x128xf32>
    %cst_80 = arith.constant 1.000000e+00 : f32
    %286 = vector.broadcast %cst_80 : f32 to vector<2x128xf32>
    %287 = arith.addf %286, %285 : vector<2x128xf32>
    %288 = arith.divf %286, %287 : vector<2x128xf32>
    %289 = arith.mulf %282, %276 : vector<2x128xf32>
    %290 = arith.addf %273, %289 : vector<2x128xf32>
    %291 = math.tanh %290 : vector<2x128xf32>
    %cst_81 = arith.constant 1.000000e+00 : f32
    %292 = vector.broadcast %cst_81 : f32 to vector<2x128xf32>
    %293 = arith.subf %292, %288 : vector<2x128xf32>
    %294 = arith.mulf %293, %291 : vector<2x128xf32>
    %295 = arith.mulf %288, %259 : vector<2x128xf32>
    %296 = arith.addf %294, %295 : vector<2x128xf32>
    %297 = arith.index_cast %c7_i32 : i32 to index
    %c0_82 = arith.constant 0 : index
    %c0_83 = arith.constant 0 : index
    %298 = vector.load %arg4[%297, %c0_82, %c0_83] : memref<8x2x128xf32, #tpu.memory_space<vmem>>, vector<1x2x128xf32>
    %299 = vector.shape_cast %298 : vector<1x2x128xf32> to vector<2x128xf32>
    %300 = vector.shape_cast %296 : vector<2x128xf32> to vector<1x2x128xf32>
    tpu.vector_store %arg4[%297, %c0_82, %c0_83], %300 {strides = array<i32>} : memref<8x2x128xf32, #tpu.memory_space<vmem>>, vector<1x2x128xf32>,
    %c8_i32 = arith.constant 8 : i32
    %c0_84 = arith.constant 0 : index
    %c0_85 = arith.constant 0 : index
    %301 = vector.load %arg5[%c0_84, %c0_85] : memref<2x128xf32, #tpu.memory_space<vmem>>, vector<2x128xf32>
    tpu.vector_store %arg5[%c0_84, %c0_85], %296 {strides = array<i32>} : memref<2x128xf32, #tpu.memory_space<vmem>>, vector<2x128xf32>,
    return
  }
  func.func @transform_0(%arg0: i32) -> (i32, i32, i32) {
    %c0_i32 = arith.constant 0 : i32
    %c0_i32_0 = arith.constant 0 : i32
    %c0_i32_1 = arith.constant 0 : i32
    return %arg0, %c0_i32, %c0_i32_0 : i32, i32, i32
  }
  func.func @transform_1(%arg0: i32) -> (i32, i32) {
    %c0_i32 = arith.constant 0 : i32
    %c0_i32_0 = arith.constant 0 : i32
    %c0_i32_1 = arith.constant 0 : i32
    return %c0_i32, %c0_i32_0 : i32, i32
  }
  func.func @transform_2(%arg0: i32) -> (i32, i32) {
    %c0_i32 = arith.constant 0 : i32
    %c0_i32_0 = arith.constant 0 : i32
    %c0_i32_1 = arith.constant 0 : i32
    return %c0_i32, %c0_i32_0 : i32, i32
  }
  func.func @transform_3(%arg0: i32) -> (i32, i32, i32) {
    %c0_i32 = arith.constant 0 : i32
    %c0_i32_0 = arith.constant 0 : i32
    %c0_i32_1 = arith.constant 0 : i32
    return %arg0, %c0_i32, %c0_i32_0 : i32, i32, i32
  }
}

</mosaic_0001>

<bundles_post_ra>
// kernel: tpu_custom_call.1
= control target key start
LH: loop header
LB: loop body
LE: loop exit
PB: predicated region body
PF: predicated region fallthrough
CT: control target
= control target key end

     0   :  { %8 = vsyncpa [#allocation4], 0  ;;  %s3398_s0 = inlined_call_operand.hbm [shape: f32[8,2,384], index: 0, kind: input, shape index: {}]   ;;  %s3399_s1 = inlined_call_operand.hbm [shape: f32[128,384], index: 1, kind: input, shape index: {}]   ;;  %s3400_s2 = inlined_call_operand.vmem [shape: f32[1,384], index: 2, kind: input, shape index: {}]   ;;  %s3401_s3 = inlined_call_operand.hbm [shape: f32[8,2,128], index: 3, kind: output, shape index: {}]  }
   0x1   :  { %9 = vsyncpa [#allocation7], 0 }
   0x2   :  { %10 = vsyncpa [#allocation5], 0  ;;  %s2879_s12 = smov [#allocation3]   ;;  %s2807_s16 = scalar_lea.hbm %s3398_s0, 768 }
   0x3   :  { %s16_s13 = sshll.u32 %s2879_s12, 4  ;;  %p2808_p0 = scmp.ne.s32.totalorder %s3398_s0, %s2807_s16  ;;  %s17_s13 = int_to_ptr.vmem [resolvable:$true] %s16_s13 }
   0x4   :  { %p2811_p1 = scmp.lt.u32.totalorder %s2807_s16, %s3398_s0 }
   0x6   :  { %p2813_p2 = pnand %p2811_p1, %p2808_p0 }
   0x8   :  { %2816 = shalt.err (!%p2813_p2)
}
   0x9   :  { %s2817_s21 = scalar_lea.vmem %s17_s13, 768  ;;  %p2822_p4 = scmp.lt.s32.totalorder %s17_s13, %s17_s13 }
   0xa   :  { %p2818_p3 = scmp.ne.s32.totalorder %s17_s13, %s2817_s21  ;;  %p2823_p5 = scmp.lt.s32.totalorder %s2817_s21, %s2817_s21 }
   0xc   :  { %p2824_p6 = por %p2823_p5, %p2822_p4 }
   0xe   :  { %p2825_p7 = pnand %p2824_p6, %p2818_p3 }
  0x10   :  { %2828 = shalt.err (!%p2825_p7)
}
  0x11   :  { %s2880_s22 = smov 96   ;;  %s2881_s23 = smov 6  }
  0x12   :  { %22 = dma.hbm_to_vmem [thread:$0]  %s3398_s0, 768, %s17_s13, [#allocation4], %s2880_s22, %s2880_s22, %s2881_s23  }
  0x13   :  { %s2882_s26 = smov [#allocation6]   ;;  %s2829_s30 = scalar_lea.hbm %s3399_s1, 6144 }
  0x14   :  { %s28_s27 = sshll.u32 %s2882_s26, 4  ;;  %p2830_p8 = scmp.ne.s32.totalorder %s3399_s1, %s2829_s30  ;;  %s29_s27 = int_to_ptr.vmem [resolvable:$true] %s28_s27 }
  0x15   :  { %p2833_p9 = scmp.lt.u32.totalorder %s2829_s30, %s3399_s1 }
  0x17   :  { %p2835_p10 = pnand %p2833_p9, %p2830_p8 }
  0x19   :  { %2838 = shalt.err (!%p2835_p10)
}
  0x1a   :  { %s2839_s8 = scalar_lea.vmem %s29_s27, 6144  ;;  %p2844_p12 = scmp.lt.s32.totalorder %s29_s27, %s29_s27 }
  0x1b   :  { %p2840_p11 = scmp.ne.s32.totalorder %s29_s27, %s2839_s8  ;;  %p2845_p13 = scmp.lt.s32.totalorder %s2839_s8, %s2839_s8 }
  0x1d   :  { %p2846_p0 = por %p2845_p13, %p2844_p12 }
  0x1f   :  { %p2847_p1 = pnand %p2846_p0, %p2840_p11 }
  0x21   :  { %2850 = shalt.err (!%p2847_p1)
}
  0x22   :  { %s2883_s0 = smov 384   ;;  %s2884_s9 = smov 24  }
  0x23   :  { %34 = dma.hbm_to_vmem [thread:$0]  %s3399_s1, 6144, %s29_s27, [#allocation7], %s2883_s0, %s2883_s0, %s2884_s9  }
  0x24   :  { %2873 = dma.done.wait [#allocation4], 768  }
  0x25   :  { %2874 = vsyncadd [#allocation4], 4294966528 }
  0x26   :  { %2875 = dma.done.wait [#allocation7], 6144  }
  0x27   :  { %2876 = vsyncadd [#allocation7], 4294961152  ;;  %v2885_v0 = vmov 0.0|0.0   ;;  %v2886_v1 = vmov 0.0   ;;  %vm2887_vm0 = vmmov 0   ;;  %v52_v2 = vld [vmem:[#allocation6 + $0x8] sm:$0xff] }
  0x28   :  { %2299 = vmatprep.subr.bf16.mxu1 %v2885_v0  ;;  %179 = vmatprep.mubr.f32.mxu0 %v2886_v1  ;;  %47 = vst [vmem:[#allocation2] sm:$0x3] %v2886_v1  ;;  %v55_v3 = vld [vmem:[#allocation6 + $0x20] sm:$0xff]  ;;  %v54_v6 = vld [vmem:[#allocation6 + $0x18] sm:$0xff]  ;;  %v61_v8 = vld [vmem:[#allocation6 + $0x50] sm:$0xff] }
  0x29   :  { %2019 = vmatprep.mubr.msk.f32.mxu1 %vm2887_vm0, %v2886_v1  ;;  %v51_v4 = vld [vmem:[#allocation6] sm:$0xff]  ;;  %v2940_v5 = vpack.c.bf16 %v55_v3, %v52_v2  ;;  %v58_v7 = vld [vmem:[#allocation6 + $0x38] sm:$0xff]  ;;  %v57_v11 = vld [vmem:[#allocation6 + $0x30] sm:$0xff] }
  0x2a   :  { %v2942_v9 = vpack.c.bf16 %v54_v6, %v51_v4  ;;  %v2944_v10 = vpack.c.bf16 %v61_v8, %v58_v7  ;;  %v60_v12 = vld [vmem:[#allocation6 + $0x48] sm:$0xff]  ;;  %v67_v14 = vld [vmem:[#allocation6 + $0x80] sm:$0xff]  ;;  %v66_v18 = vld [vmem:[#allocation6 + $0x78] sm:$0xff] }
  0x2b   :  { %v64_v13 = vld [vmem:[#allocation6 + $0x68] sm:$0xff]  ;;  %2268 = vmatprep.subr.bf16.mxu0 %v2940_v5  ;;  %v2948_v15 = vpack.c.bf16 %v60_v12, %v57_v11  ;;  %v63_v17 = vld [vmem:[#allocation6 + $0x60] sm:$0xff]  ;;  %v70_v19 = vld [vmem:[#allocation6 + $0x98] sm:$0xff] }
  0x2c   :  { %2270 = vmatpush1.bf16.msra.mxu0 %v2942_v9  ;;  %v2951_v16 = vpack.c.bf16 %v67_v14, %v64_v13  ;;  %v73_v20 = vld [vmem:[#allocation6 + $0xb0] sm:$0xff]  ;;  %v2954_v21 = vpack.c.bf16 %v66_v18, %v63_v17  ;;  %v72_v24 = vld [vmem:[#allocation6 + $0xa8] sm:$0xff]  ;;  %v79_v26 = vld [vmem:[#allocation6 + $0xe0] sm:$0xff]  ;;  %v100_v18 = vlaneseq }
  0x2d   :  { %2272 = vmatprep.subr.bf16.mxu0 %v2944_v10  ;;  %v2957_v22 = vpack.c.bf16 %v73_v20, %v70_v19  ;;  %v69_v23 = vld [vmem:[#allocation6 + $0x90] sm:$0xff]  ;;  %v76_v25 = vld [vmem:[#allocation6 + $0xc8] sm:$0xff]  ;;  %v59_v30 = vld [vmem:[#allocation6 + $0x40] sm:$0xff] }
  0x2e   :  { %v53_v27 = vld [vmem:[#allocation6 + $0x10] sm:$0xff]  ;;  %v56_v28 = vld [vmem:[#allocation6 + $0x28] sm:$0xff]  ;;  %v2962_v31 = vpack.c.bf16 %v72_v24, %v69_v23  ;;  %v62_v32 = vld [vmem:[#allocation6 + $0x58] sm:$0xff]  ;;  %v2965_v33 = vpack.c.bf16 %v79_v26, %v76_v25  ;;  %v101_v19 = vshrl.u32 %v100_v18, 7 }
  0x2f   :  { %v2959_v29 = vpack.c.bf16 %v56_v28, %v53_v27  ;;  %v75_v34 = vld [vmem:[#allocation6 + $0xc0] sm:$0xff]  ;;  %v78_v35 = vld [vmem:[#allocation6 + $0xd8] sm:$0xff]  ;;  %v2968_v37 = vpack.c.bf16 %v62_v32, %v59_v30  ;;  %v85_v38 = vld [vmem:[#allocation6 + $0x110] sm:$0xff] }
  0x30   :  { %2274 = vmatpush1.bf16.msra.mxu0 %v2948_v15  ;;  %v82_v36 = vld [vmem:[#allocation6 + $0xf8] sm:$0xff]  ;;  %v65_v39 = vld [vmem:[#allocation6 + $0x70] sm:$0xff]  ;;  %v68_v40 = vld [vmem:[#allocation6 + $0x88] sm:$0xff]  ;;  %v2972_v41 = vpack.c.bf16 %v78_v35, %v75_v34  ;;  %v102_v20 = vsub.s32 0, %v101_v19  ;;  %v106_v24 = vsub.s32 1, %v101_v19 }
  0x31   :  { %2276 = vmatprep.subr.bf16.mxu0 %v2951_v16  ;;  %2301 = vmatpush3.bf16.msra.mxu1 %v2959_v29  ;;  %v2975_v42 = vpack.c.bf16 %v85_v38, %v82_v36  ;;  %v81_v43 = vld [vmem:[#allocation6 + $0xf0] sm:$0xff]  ;;  %v84_v44 = vld [vmem:[#allocation6 + $0x108] sm:$0xff]  ;;  %v2978_v46 = vpack.c.bf16 %v68_v40, %v65_v39  ;;  %v91_v47 = vld [vmem:[#allocation6 + $0x140] sm:$0xff] }
  0x32   :  { %2302 = vmatprep.subr.bf16.mxu1 %v2885_v0  ;;  %v88_v45 = vld [vmem:[#allocation6 + $0x128] sm:$0xff]  ;;  %v71_v48 = vld [vmem:[#allocation6 + $0xa0] sm:$0xff]  ;;  %v74_v49 = vld [vmem:[#allocation6 + $0xb8] sm:$0xff]  ;;  %v2982_v50 = vpack.c.bf16 %v84_v44, %v81_v43 }
  0x33   :  { %v2985_v51 = vpack.c.bf16 %v91_v47, %v88_v45  ;;  %v87_v52 = vld [vmem:[#allocation6 + $0x120] sm:$0xff]  ;;  %v90_v53 = vld [vmem:[#allocation6 + $0x138] sm:$0xff]  ;;  %v2988_v55 = vpack.c.bf16 %v74_v49, %v71_v48  ;;  %v97_v56 = vld [vmem:[#allocation6 + $0x170] sm:$0xff]  ;;  %v110_v48 = vsub.s32 2, %v101_v19 }
  0x34   :  { %2278 = vmatpush1.bf16.msra.mxu0 %v2954_v21  ;;  %v94_v54 = vld [vmem:[#allocation6 + $0x158] sm:$0xff]  ;;  %v77_v57 = vld [vmem:[#allocation6 + $0xd0] sm:$0xff]  ;;  %v80_v58 = vld [vmem:[#allocation6 + $0xe8] sm:$0xff]  ;;  %v2992_v59 = vpack.c.bf16 %v90_v53, %v87_v52 }
  0x35   :  { %2280 = vmatprep.subr.bf16.mxu0 %v2957_v22  ;;  %2304 = vmatpush3.bf16.msra.mxu1 %v2968_v37  ;;  %v2995_v60 = vpack.c.bf16 %v97_v56, %v94_v54  ;;  %v93_v61 = vld [vmem:[#allocation6 + $0x150] sm:$0xff]  ;;  %v96_v62 = vld [vmem:[#allocation6 + $0x168] sm:$0xff]  ;;  %v2998_v63 = vpack.c.bf16 %v80_v58, %v77_v57  ;;  %v83_v2 = vld [vmem:[#allocation6 + $0x100] sm:$0xff] }
  0x36   :  { %2305 = vmatprep.subr.bf16.mxu1 %v2885_v0  ;;  %v86_v3 = vld [vmem:[#allocation6 + $0x118] sm:$0xff]  ;;  %v3002_v4 = vpack.c.bf16 %v96_v62, %v93_v61  ;;  %v89_v7 = vld [vmem:[#allocation6 + $0x130] sm:$0xff]  ;;  %v92_v8 = vld [vmem:[#allocation6 + $0x148] sm:$0xff] }
  0x37   :  { %v3006_v6 = vpack.c.bf16 %v86_v3, %v83_v2  ;;  %v3010_v11 = vld [vmem:[#allocation2] sm:$0x3]  ;;  %v3013_v12 = vpack.c.bf16 %v92_v8, %v89_v7  ;;  %v95_v13 = vld [vmem:[#allocation6 + $0x160] sm:$0xff]  ;;  %v98_v14 = vld [vmem:[#allocation6 + $0x178] sm:$0xff] }
  0x38   :  { %2282 = vmatpush1.bf16.msra.mxu0 %v2962_v31  ;;  %v3021_v17 = vpack.c.bf16 %v98_v14, %v95_v13  ;;  %v48_v23 = vld [vmem:[%s3400_s2] sm:$0x7]  ;;  %s2888_s2 = smov [#allocation8]  }
  0x39   :  { %2284 = vmatprep.subr.bf16.mxu0 %v2965_v33  ;;  %2307 = vmatpush3.bf16.msra.mxu1 %v2978_v46  ;;  %v3063_v25 = vrot.slane %v48_v23, %v102_v20  ;;  %v3065_v26 = vrot.slane %v48_v23, %v106_v24  ;;  %v50_v27 = vld [vmem:[#allocation3] sm:$0x3f]  ;;  %v3069_v49 = vrot.slane %v48_v23, %v110_v48  ;;  %s1822_s13 = sshll.u32 %s2888_s2, 4  ;;  %s1823_s13 = int_to_ptr.vmem [resolvable:$true] %s1822_s13 }
  0x3a   :  { %2308 = vmatprep.subr.bf16.mxu1 %v2885_v0  ;;  %v264_v35 = vrot.slane %v50_v27, 2  ;;  %v274_v56 = vrot.slane %v50_v27, 4  ;;  %s2851_s14 = scalar_lea.vmem %s1823_s13, 256  ;;  %p2856_p3 = scmp.lt.s32.totalorder %s1823_s13, %s1823_s13 }
  0x3b   :  { %p2852_p2 = scmp.ne.s32.totalorder %s1823_s13, %s2851_s14  ;;  %p2857_p4 = scmp.lt.s32.totalorder %s2851_s14, %s2851_s14 }
  0x3c   :  { %2286 = vmatpush1.bf16.msra.mxu0 %v2972_v41 }
  0x3d   :  { %2288 = vmatprep.subr.bf16.mxu0 %v2975_v42  ;;  %2310 = vmatpush3.bf16.msra.mxu1 %v2988_v55  ;;  %p2858_p5 = por %p2857_p4, %p2856_p3 }
  0x3e   :  { %2311 = vmatprep.subr.bf16.mxu1 %v2885_v0 }
  0x3f   :  { %p2859_p6 = pnand %p2858_p5, %p2852_p2 }
  0x40   :  { %2290 = vmatpush1.bf16.msra.mxu0 %v2982_v50 }
  0x41   :  { %2292 = vmatprep.subr.bf16.mxu0 %v2985_v51  ;;  %2313 = vmatpush3.bf16.msra.mxu1 %v2998_v63 }
  0x42   :  { %2314 = vmatprep.subr.bf16.mxu1 %v2885_v0 }
  0x44   :  { %2294 = vmatpush1.bf16.msra.mxu0 %v2992_v59 }
  0x45   :  { %2296 = vmatprep.subr.bf16.mxu0 %v2995_v60  ;;  %2316 = vmatpush3.bf16.msra.mxu1 %v3006_v6 }
  0x46   :  { %2317 = vmatprep.subr.bf16.mxu1 %v2885_v0 }
  0x48   :  { %2298 = vmatpush1.bf16.msra.mxu0 %v3002_v4 }
  0x49   :  { %2324 = vmatprep.subr.bf16.mxu0 %v2940_v5  ;;  %2319 = vmatpush3.bf16.msra.mxu1 %v3013_v12 }
  0x4a   :  { %2320 = vmatprep.subr.bf16.mxu1 %v2885_v0 }
  0x4b   :  { %180 = vmatmul.mubr.f32.vlgmr.msra.gmra.mrb[0].mxu0 %v3010_v11 }
  0x4c   :  { %2326 = vmatpush1.bf16.msra.mxu0 %v2942_v9  ;;  %397 = vmatprep.mubr.f32.mxu0 %v2886_v1 }
  0x4d   :  { %2328 = vmatprep.subr.bf16.mxu0 %v2944_v10  ;;  %2322 = vmatpush3.bf16.msra.mxu1 %v3021_v17 }
  0x4e   :  { %2355 = vmatprep.subr.bf16.mxu1 %v2885_v0 }
  0x50   :  { %2330 = vmatpush1.bf16.msra.mxu0 %v2948_v15  ;;  %2020 = vmatmul.mubr.f32.vlgmr.msra.gmra.mrb[0].mxu1 %v3010_v11 }
  0x51   :  { %2332 = vmatprep.subr.bf16.mxu0 %v2951_v16  ;;  %2357 = vmatpush3.bf16.msra.mxu1 %v2959_v29 }
  0x52   :  { %2358 = vmatprep.subr.bf16.mxu1 %v2885_v0  ;;  %2054 = vmatprep.mubr.msk.f32.mxu1 %vm2887_vm0, %v2886_v1 }
  0x54   :  { %2334 = vmatpush1.bf16.msra.mxu0 %v2954_v21 }
  0x55   :  { %2336 = vmatprep.subr.bf16.mxu0 %v2957_v22  ;;  %2360 = vmatpush3.bf16.msra.mxu1 %v2968_v37 }
  0x56   :  { %2361 = vmatprep.subr.bf16.mxu1 %v2885_v0 }
  0x58   :  { %2338 = vmatpush1.bf16.msra.mxu0 %v2962_v31 }
  0x59   :  { %2340 = vmatprep.subr.bf16.mxu0 %v2965_v33  ;;  %2363 = vmatpush3.bf16.msra.mxu1 %v2978_v46 }
  0x5a   :  { %2364 = vmatprep.subr.bf16.mxu1 %v2885_v0 }
  0x5c   :  { %2342 = vmatpush1.bf16.msra.mxu0 %v2972_v41 }
  0x5d   :  { %2344 = vmatprep.subr.bf16.mxu0 %v2975_v42  ;;  %2366 = vmatpush3.bf16.msra.mxu1 %v2988_v55 }
  0x5e   :  { %2367 = vmatprep.subr.bf16.mxu1 %v2885_v0 }
  0x60   :  { %2346 = vmatpush1.bf16.msra.mxu0 %v2982_v50 }
  0x61   :  { %2348 = vmatprep.subr.bf16.mxu0 %v2985_v51  ;;  %2369 = vmatpush3.bf16.msra.mxu1 %v2998_v63 }
  0x62   :  { %2370 = vmatprep.subr.bf16.mxu1 %v2885_v0 }
  0x64   :  { %2350 = vmatpush1.bf16.msra.mxu0 %v2992_v59 }
  0x65   :  { %2352 = vmatprep.subr.bf16.mxu0 %v2995_v60  ;;  %2372 = vmatpush3.bf16.msra.mxu1 %v3006_v6 }
  0x66   :  { %2373 = vmatprep.subr.bf16.mxu1 %v2885_v0 }
  0x68   :  { %2354 = vmatpush1.bf16.msra.mxu0 %v3002_v4 }
  0x69   :  { %2380 = vmatprep.subr.bf16.mxu0 %v2940_v5  ;;  %2375 = vmatpush3.bf16.msra.mxu1 %v3013_v12 }
  0x6a   :  { %2376 = vmatprep.subr.bf16.mxu1 %v2885_v0 }
  0x6d   :  { %2378 = vmatpush3.bf16.msra.mxu1 %v3021_v17 }
  0x6e   :  { %2411 = vmatprep.subr.bf16.mxu1 %v2885_v0 }
 0x11e   :  { %v181_v28 = vpop.f32.mrb[0].mxu0 }
 0x11f   :  { %v182_v30 = vadd.f32 %v181_v28, %v3063_v25  ;;  %v183_v32 = vpop.f32.mrb[1].mxu0 }
 0x120   :  { %v184_v34 = vadd.f32 %v183_v32, %v3065_v26 }
 0x121   :  { %v256_v36 = vadd.f32 %v182_v30, %v50_v27 }
 0x122   :  { %v266_v39 = vadd.f32 %v264_v35, %v184_v34 }
 0x123   :  { %v1835_v38 = vmul.f32 -1.442695, %v256_v36  ;;  %v252_v40 = vpop.f32.mrb[0].mxu1 }
 0x124   :  { %v1836_v43 = vmul.f32 -1.442695, %v266_v39  ;;  %v2021_v44 = vpop.f32.mrb[1].mxu1  ;;  %v253_v54 = vadd.f32 %v252_v40, %v3069_v49 }
 0x125   :  { %2727 = vpow2.f32 %v1835_v38 }
 0x126   :  { %2729 = vpow2.f32 %v1836_v43 }
 0x12f   :  { %v2728_v45 = vpop.eup %2727 }
 0x130   :  { %v260_v47 = vadd.f32 1.0, %v2728_v45  ;;  %v2730_v52 = vpop.eup %2729 }
 0x131   :  { %v270_v53 = vadd.f32 1.0, %v2730_v52 }
 0x132   :  { %2731 = vrcp.f32 %v260_v47 }
 0x133   :  { %2733 = vrcp.f32 %v270_v53 }
 0x13c   :  { %v2732_v57 = vpop.eup %2731 }
 0x13d   :  { %v273_v58 = vmul.f32 %v2732_v57, %v253_v54  ;;  %v2734_v62 = vpop.eup %2733 }
 0x13e   :  { %v278_v2 = vsub.f32 1.0, %v2734_v62  ;;  %v280_v8 = vmul.f32 %v2734_v62, %v3010_v11  ;;  %v284_v11 = vld [vmem:[#allocation3 + $0x6] sm:$0x3f] }
 0x13f   :  { %v276_v61 = vadd.f32 %v274_v56, %v273_v58  ;;  %v482_v27 = vrot.slane %v284_v11, 2  ;;  %v492_v40 = vrot.slane %v284_v11, 4 }
 0x141   :  { %2735 = vtanh.f32 %v276_v61 }
 0x14b   :  { %v2736_v3 = vpop.eup %2735 }
 0x14c   :  { %v279_v7 = vmul.f32 %v2736_v3, %v278_v2 }
 0x14e   :  { %v3073_v13 = vadd.f32 %v280_v8, %v279_v7  ;;  %v943_v8 = vld [vmem:[#allocation6 + $0x8] sm:$0xff] }
 0x150   :  { %282 = vst [vmem:[#allocation8] sm:$0x3] %v3073_v13  ;;  %398 = vmatmul.mubr.f32.vlgmr.msra.gmra.mrb[2].mxu0 %v3073_v13  ;;  %2055 = vmatmul.mubr.f32.vlgmr.msra.gmra.mrb[2].mxu1 %v3073_v13 }
 0x151   :  { %2382 = vmatpush1.bf16.msra.mxu0 %v2942_v9  ;;  %2413 = vmatpush3.bf16.msra.mxu1 %v2959_v29 }
 0x152   :  { %2384 = vmatprep.subr.bf16.mxu0 %v2944_v10  ;;  %2414 = vmatprep.subr.bf16.mxu1 %v2885_v0 }
 0x153   :  { %616 = vmatprep.mubr.f32.mxu0 %v2886_v1  ;;  %2089 = vmatprep.mubr.msk.f32.mxu1 %vm2887_vm0, %v2886_v1 }
 0x155   :  { %2386 = vmatpush1.bf16.msra.mxu0 %v2948_v15  ;;  %2416 = vmatpush3.bf16.msra.mxu1 %v2968_v37 }
 0x156   :  { %2388 = vmatprep.subr.bf16.mxu0 %v2951_v16  ;;  %2417 = vmatprep.subr.bf16.mxu1 %v2885_v0 }
 0x159   :  { %2390 = vmatpush1.bf16.msra.mxu0 %v2954_v21  ;;  %2419 = vmatpush3.bf16.msra.mxu1 %v2978_v46 }
 0x15a   :  { %2392 = vmatprep.subr.bf16.mxu0 %v2957_v22  ;;  %2420 = vmatprep.subr.bf16.mxu1 %v2885_v0 }
 0x15d   :  { %2394 = vmatpush1.bf16.msra.mxu0 %v2962_v31  ;;  %2422 = vmatpush3.bf16.msra.mxu1 %v2988_v55 }
 0x15e   :  { %2396 = vmatprep.subr.bf16.mxu0 %v2965_v33  ;;  %2423 = vmatprep.subr.bf16.mxu1 %v2885_v0 }
 0x161   :  { %2398 = vmatpush1.bf16.msra.mxu0 %v2972_v41  ;;  %2425 = vmatpush3.bf16.msra.mxu1 %v2998_v63 }
 0x162   :  { %2400 = vmatprep.subr.bf16.mxu0 %v2975_v42  ;;  %2426 = vmatprep.subr.bf16.mxu1 %v2885_v0 }
 0x165   :  { %2402 = vmatpush1.bf16.msra.mxu0 %v2982_v50  ;;  %2428 = vmatpush3.bf16.msra.mxu1 %v3006_v6 }
 0x166   :  { %2404 = vmatprep.subr.bf16.mxu0 %v2985_v51  ;;  %2429 = vmatprep.subr.bf16.mxu1 %v2885_v0 }
 0x169   :  { %2406 = vmatpush1.bf16.msra.mxu0 %v2992_v59  ;;  %2431 = vmatpush3.bf16.msra.mxu1 %v3013_v12 }
 0x16a   :  { %2408 = vmatprep.subr.bf16.mxu0 %v2995_v60  ;;  %2432 = vmatprep.subr.bf16.mxu1 %v2885_v0 }
 0x16d   :  { %2410 = vmatpush1.bf16.msra.mxu0 %v3002_v4  ;;  %2434 = vmatpush3.bf16.msra.mxu1 %v3021_v17 }
 0x16e   :  { %2436 = vmatprep.subr.bf16.mxu0 %v2940_v5  ;;  %2467 = vmatprep.subr.bf16.mxu1 %v2885_v0 }
 0x223   :  { %v399_v14 = vpop.f32.mrb[2].mxu0  ;;  %v470_v18 = vpop.f32.mrb[2].mxu1 }
 0x224   :  { %v400_v19 = vadd.f32 %v399_v14, %v3063_v25  ;;  %v401_v20 = vpop.f32.mrb[3].mxu0  ;;  %v2056_v23 = vpop.f32.mrb[3].mxu1  ;;  %v471_v39 = vadd.f32 %v470_v18, %v3069_v49  ;;  %v945_v14 = vld [vmem:[#allocation6 + $0x18] sm:$0xff] }
 0x225   :  { %v402_v24 = vadd.f32 %v401_v20, %v3065_v26  ;;  %v948_v23 = vld [vmem:[#allocation6 + $0x30] sm:$0xff] }
 0x226   :  { %v474_v28 = vadd.f32 %v400_v19, %v284_v11  ;;  %v949_v19 = vld [vmem:[#allocation6 + $0x38] sm:$0xff] }
 0x227   :  { %v484_v32 = vadd.f32 %v482_v27, %v402_v24  ;;  %v955_v27 = vld [vmem:[#allocation6 + $0x68] sm:$0xff] }
 0x228   :  { %v1837_v30 = vmul.f32 -1.442695, %v474_v28  ;;  %v958_v28 = vld [vmem:[#allocation6 + $0x80] sm:$0xff] }
 0x229   :  { %v1838_v34 = vmul.f32 -1.442695, %v484_v32  ;;  %v954_v32 = vld [vmem:[#allocation6 + $0x60] sm:$0xff] }
 0x22a   :  { %2737 = vpow2.f32 %v1837_v30  ;;  %v3186_v30 = vpack.c.bf16 %v958_v28, %v955_v27 }
 0x22b   :  { %2739 = vpow2.f32 %v1838_v34  ;;  %v957_v34 = vld [vmem:[#allocation6 + $0x78] sm:$0xff] }
 0x234   :  { %v2738_v35 = vpop.eup %2737 }
 0x235   :  { %v478_v5 = vadd.f32 1.0, %v2738_v35  ;;  %v2740_v36 = vpop.eup %2739  ;;  %v3188_v35 = vpack.c.bf16 %v957_v34, %v954_v32 }
 0x236   :  { %v488_v38 = vadd.f32 1.0, %v2740_v36  ;;  %v964_v36 = vld [vmem:[#allocation6 + $0xb0] sm:$0xff] }
 0x237   :  { %2741 = vrcp.f32 %v478_v5  ;;  %v961_v5 = vld [vmem:[#allocation6 + $0x98] sm:$0xff] }
 0x238   :  { %2743 = vrcp.f32 %v488_v38  ;;  %v3192_v38 = vpack.c.bf16 %v964_v36, %v961_v5 }
 0x241   :  { %v2742_v43 = vpop.eup %2741 }
 0x242   :  { %v491_v44 = vmul.f32 %v2742_v43, %v471_v39  ;;  %v2744_v47 = vpop.eup %2743  ;;  %v960_v39 = vld [vmem:[#allocation6 + $0x90] sm:$0xff]  ;;  %v962_v43 = vld [vmem:[#allocation6 + $0xa0] sm:$0xff] }
 0x243   :  { %v496_v48 = vsub.f32 1.0, %v2744_v47  ;;  %v498_v54 = vmul.f32 %v2744_v47, %v3073_v13  ;;  %v946_v13 = vld [vmem:[#allocation6 + $0x20] sm:$0xff] }
 0x244   :  { %v494_v45 = vadd.f32 %v492_v40, %v491_v44  ;;  %v3174_v11 = vpack.c.bf16 %v946_v13, %v943_v8  ;;  %v963_v40 = vld [vmem:[#allocation6 + $0xa8] sm:$0xff]  ;;  %v986_v13 = vld [vmem:[#allocation6 + $0x160] sm:$0xff] }
 0x245   :  { %v3194_v44 = vpack.c.bf16 %v963_v40, %v960_v39  ;;  %v987_v8 = vld [vmem:[#allocation6 + $0x168] sm:$0xff] }
 0x246   :  { %2745 = vtanh.f32 %v494_v45  ;;  %v965_v45 = vld [vmem:[#allocation6 + $0xb8] sm:$0xff] }
 0x247   :  { %v3197_v47 = vpack.c.bf16 %v965_v45, %v962_v43 }
 0x250   :  { %v2746_v52 = vpop.eup %2745 }
 0x251   :  { %v497_v53 = vmul.f32 %v2746_v52, %v496_v48  ;;  %v967_v48 = vld [vmem:[#allocation6 + $0xc8] sm:$0xff]  ;;  %v970_v52 = vld [vmem:[#allocation6 + $0xe0] sm:$0xff] }
 0x253   :  { %v3117_v56 = vadd.f32 %v498_v54, %v497_v53  ;;  %v3201_v53 = vpack.c.bf16 %v970_v52, %v967_v48  ;;  %v966_v54 = vld [vmem:[#allocation6 + $0xc0] sm:$0xff] }
 0x255   :  { %501 = vst [vmem:[#allocation8 + $0x2] sm:$0x3] %v3117_v56  ;;  %617 = vmatmul.mubr.f32.vlgmr.msra.gmra.mrb[4].mxu0 %v3117_v56  ;;  %2090 = vmatmul.mubr.f32.vlgmr.msra.gmra.mrb[4].mxu1 %v3117_v56 }
 0x256   :  { %2438 = vmatpush1.bf16.msra.mxu0 %v2942_v9  ;;  %2469 = vmatpush3.bf16.msra.mxu1 %v2959_v29  ;;  %v503_v9 = vld [vmem:[#allocation3 + $0xc] sm:$0x3f] }
 0x257   :  { %2440 = vmatprep.subr.bf16.mxu0 %v2944_v10  ;;  %2470 = vmatprep.subr.bf16.mxu1 %v2885_v0 }
 0x258   :  { %835 = vmatprep.mubr.f32.mxu0 %v2886_v1  ;;  %2124 = vmatprep.mubr.msk.f32.mxu1 %vm2887_vm0, %v2886_v1 }
 0x25a   :  { %2442 = vmatpush1.bf16.msra.mxu0 %v2948_v15  ;;  %2472 = vmatpush3.bf16.msra.mxu1 %v2968_v37 }
 0x25b   :  { %2444 = vmatprep.subr.bf16.mxu0 %v2951_v16  ;;  %2473 = vmatprep.subr.bf16.mxu1 %v2885_v0 }
 0x25e   :  { %2446 = vmatpush1.bf16.msra.mxu0 %v2954_v21  ;;  %2475 = vmatpush3.bf16.msra.mxu1 %v2978_v46 }
 0x25f   :  { %2448 = vmatprep.subr.bf16.mxu0 %v2957_v22  ;;  %2476 = vmatprep.subr.bf16.mxu1 %v2885_v0 }
 0x262   :  { %2450 = vmatpush1.bf16.msra.mxu0 %v2962_v31  ;;  %2478 = vmatpush3.bf16.msra.mxu1 %v2988_v55 }
 0x263   :  { %2452 = vmatprep.subr.bf16.mxu0 %v2965_v33  ;;  %2479 = vmatprep.subr.bf16.mxu1 %v2885_v0  ;;  %v701_v33 = vrot.slane %v503_v9, 2 }
 0x266   :  { %2454 = vmatpush1.bf16.msra.mxu0 %v2972_v41  ;;  %2481 = vmatpush3.bf16.msra.mxu1 %v2998_v63 }
 0x267   :  { %2456 = vmatprep.subr.bf16.mxu0 %v2975_v42  ;;  %2482 = vmatprep.subr.bf16.mxu1 %v2885_v0 }
 0x26a   :  { %2458 = vmatpush1.bf16.msra.mxu0 %v2982_v50  ;;  %2484 = vmatpush3.bf16.msra.mxu1 %v3006_v6  ;;  %v711_v6 = vrot.slane %v503_v9, 4 }
 0x26b   :  { %2460 = vmatprep.subr.bf16.mxu0 %v2985_v51  ;;  %2485 = vmatprep.subr.bf16.mxu1 %v2885_v0 }
 0x26e   :  { %2462 = vmatpush1.bf16.msra.mxu0 %v2992_v59  ;;  %2487 = vmatpush3.bf16.msra.mxu1 %v3013_v12 }
 0x26f   :  { %2464 = vmatprep.subr.bf16.mxu0 %v2995_v60  ;;  %2488 = vmatprep.subr.bf16.mxu1 %v2885_v0 }
 0x272   :  { %2466 = vmatpush1.bf16.msra.mxu0 %v3002_v4  ;;  %2490 = vmatpush3.bf16.msra.mxu1 %v3021_v17 }
 0x273   :  { %2523 = vmatprep.subr.bf16.mxu1 %v2885_v0  ;;  %2492 = vmatprep.subr.bf16.mxu0 %v3174_v11 }
 0x328   :  { %v618_v10 = vpop.f32.mrb[4].mxu0  ;;  %v689_v15 = vpop.f32.mrb[4].mxu1 }
 0x329   :  { %v619_v16 = vadd.f32 %v618_v10, %v3063_v25  ;;  %v620_v21 = vpop.f32.mrb[5].mxu0  ;;  %v2091_v22 = vpop.f32.mrb[5].mxu1  ;;  %v690_v4 = vadd.f32 %v689_v15, %v3069_v49  ;;  %v971_v15 = vld [vmem:[#allocation6 + $0xe8] sm:$0xff] }
 0x32a   :  { %v621_v31 = vadd.f32 %v620_v21, %v3065_v26  ;;  %v973_v21 = vld [vmem:[#allocation6 + $0xf8] sm:$0xff]  ;;  %v976_v22 = vld [vmem:[#allocation6 + $0x110] sm:$0xff] }
 0x32b   :  { %v693_v41 = vadd.f32 %v619_v16, %v503_v9  ;;  %v968_v9 = vld [vmem:[#allocation6 + $0xd0] sm:$0xff] }
 0x32c   :  { %v703_v50 = vadd.f32 %v701_v33, %v621_v31  ;;  %v3207_v16 = vpack.c.bf16 %v971_v15, %v968_v9  ;;  %v972_v31 = vld [vmem:[#allocation6 + $0xf0] sm:$0xff]  ;;  %v3211_v33 = vpack.c.bf16 %v976_v22, %v973_v21 }
 0x32d   :  { %v1839_v42 = vmul.f32 -1.442695, %v693_v41  ;;  %v975_v41 = vld [vmem:[#allocation6 + $0x108] sm:$0xff] }
 0x32e   :  { %v1840_v51 = vmul.f32 -1.442695, %v703_v50  ;;  %v977_v50 = vld [vmem:[#allocation6 + $0x118] sm:$0xff] }
 0x32f   :  { %2747 = vpow2.f32 %v1839_v42  ;;  %v974_v42 = vld [vmem:[#allocation6 + $0x100] sm:$0xff] }
 0x330   :  { %2749 = vpow2.f32 %v1840_v51  ;;  %v3214_v51 = vpack.c.bf16 %v975_v41, %v972_v31 }
 0x339   :  { %v2748_v55 = vpop.eup %2747 }
 0x33a   :  { %v697_v59 = vadd.f32 1.0, %v2748_v55  ;;  %v2750_v60 = vpop.eup %2749  ;;  %v3216_v55 = vpack.c.bf16 %v977_v50, %v974_v42 }
 0x33b   :  { %v707_v63 = vadd.f32 1.0, %v2750_v60  ;;  %v982_v60 = vld [vmem:[#allocation6 + $0x140] sm:$0xff] }
 0x33c   :  { %2751 = vrcp.f32 %v697_v59  ;;  %v979_v59 = vld [vmem:[#allocation6 + $0x128] sm:$0xff] }
 0x33d   :  { %2753 = vrcp.f32 %v707_v63  ;;  %v978_v63 = vld [vmem:[#allocation6 + $0x120] sm:$0xff] }
 0x346   :  { %v2752_v12 = vpop.eup %2751 }
 0x347   :  { %v710_v17 = vmul.f32 %v2752_v12, %v690_v4  ;;  %v2754_v58 = vpop.eup %2753  ;;  %v3219_v4 = vpack.c.bf16 %v982_v60, %v979_v59  ;;  %v980_v12 = vld [vmem:[#allocation6 + $0x130] sm:$0xff] }
 0x348   :  { %v715_v61 = vsub.f32 1.0, %v2754_v58  ;;  %v717_v3 = vmul.f32 %v2754_v58, %v3117_v56  ;;  %v969_v56 = vld [vmem:[#allocation6 + $0xd8] sm:$0xff] }
 0x349   :  { %v713_v57 = vadd.f32 %v711_v6, %v710_v17  ;;  %v3204_v10 = vpack.c.bf16 %v969_v56, %v966_v54  ;;  %v981_v6 = vld [vmem:[#allocation6 + $0x138] sm:$0xff]  ;;  %v983_v17 = vld [vmem:[#allocation6 + $0x148] sm:$0xff] }
 0x34a   :  { %v985_v58 = vld [vmem:[#allocation6 + $0x158] sm:$0xff] }
 0x34b   :  { %2755 = vtanh.f32 %v713_v57  ;;  %v3222_v57 = vpack.c.bf16 %v981_v6, %v978_v63  ;;  %v1166_v63 = vld [vmem:[#allocation6 + $0x28] sm:$0xff] }
 0x355   :  { %v2756_v62 = vpop.eup %2755 }
 0x356   :  { %v716_v2 = vmul.f32 %v2756_v62, %v715_v61  ;;  %v988_v61 = vld [vmem:[#allocation6 + $0x170] sm:$0xff]  ;;  %v3226_v62 = vpack.c.bf16 %v983_v17, %v980_v12  ;;  %v1169_v12 = vld [vmem:[#allocation6 + $0x40] sm:$0xff]  ;;  %v1172_v17 = vld [vmem:[#allocation6 + $0x58] sm:$0xff] }
 0x358   :  { %v3160_v7 = vadd.f32 %v717_v3, %v716_v2  ;;  %v3228_v2 = vpack.c.bf16 %v988_v61, %v985_v58  ;;  %v984_v3 = vld [vmem:[#allocation6 + $0x150] sm:$0xff]  ;;  %v3275_v58 = vpack.c.bf16 %v1172_v17, %v1169_v12 }
 0x359   :  { %v1175_v61 = vld [vmem:[#allocation6 + $0x70] sm:$0xff] }
 0x35a   :  { %720 = vst [vmem:[#allocation8 + $0x4] sm:$0x3] %v3160_v7  ;;  %836 = vmatmul.mubr.f32.vlgmr.msra.gmra.mrb[6].mxu0 %v3160_v7  ;;  %2125 = vmatmul.mubr.f32.vlgmr.msra.gmra.mrb[6].mxu1 %v3160_v7 }
 0x35b   :  { %2525 = vmatpush3.bf16.msra.mxu1 %v2959_v29  ;;  %1054 = vmatprep.mubr.f32.mxu0 %v2886_v1  ;;  %v942_v29 = vld [vmem:[#allocation6] sm:$0xff] }
 0x35c   :  { %2526 = vmatprep.subr.bf16.mxu1 %v2885_v0  ;;  %2159 = vmatprep.mubr.msk.f32.mxu1 %vm2887_vm0, %v2886_v1  ;;  %v3176_v18 = vpack.c.bf16 %v945_v14, %v942_v29  ;;  %v989_v29 = vld [vmem:[#allocation6 + $0x178] sm:$0xff]  ;;  %v3232_v14 = vpack.c.bf16 %v987_v8, %v984_v3  ;;  %v1178_v3 = vld [vmem:[#allocation6 + $0x88] sm:$0xff] }
 0x35d   :  { %v3279_v8 = vpack.c.bf16 %v1178_v3, %v1175_v61 }
 0x35e   :  { %2494 = vmatpush1.bf16.msra.mxu0 %v3176_v18 }
 0x35f   :  { %2528 = vmatpush3.bf16.msra.mxu1 %v2968_v37  ;;  %v952_v37 = vld [vmem:[#allocation6 + $0x50] sm:$0xff] }
 0x360   :  { %2529 = vmatprep.subr.bf16.mxu1 %v2885_v0  ;;  %v3180_v20 = vpack.c.bf16 %v952_v37, %v949_v19  ;;  %v3236_v19 = vpack.c.bf16 %v989_v29, %v986_v13  ;;  %v722_v37 = vld [vmem:[#allocation3 + $0x12] sm:$0x3f]  ;;  %v941_v13 = vld [vmem:[#allocation3 + $0x18] sm:$0x3f] }
 0x361   :  { %v920_v5 = vrot.slane %v722_v37, 2  ;;  %v930_v9 = vrot.slane %v722_v37, 4 }
 0x362   :  { %2496 = vmatprep.subr.bf16.mxu0 %v3180_v20 }
 0x363   :  { %2531 = vmatpush3.bf16.msra.mxu1 %v2978_v46  ;;  %v951_v46 = vld [vmem:[#allocation6 + $0x48] sm:$0xff] }
 0x364   :  { %2532 = vmatprep.subr.bf16.mxu1 %v2885_v0  ;;  %v3182_v24 = vpack.c.bf16 %v951_v46, %v948_v23 }
 0x366   :  { %2498 = vmatpush1.bf16.msra.mxu0 %v3182_v24 }
 0x367   :  { %2500 = vmatprep.subr.bf16.mxu0 %v3186_v30  ;;  %2534 = vmatpush3.bf16.msra.mxu1 %v3197_v47 }
 0x368   :  { %2535 = vmatprep.subr.bf16.mxu1 %v2885_v0 }
 0x36a   :  { %2502 = vmatpush1.bf16.msra.mxu0 %v3188_v35 }
 0x36b   :  { %2504 = vmatprep.subr.bf16.mxu0 %v3192_v38  ;;  %2537 = vmatpush3.bf16.msra.mxu1 %v3207_v16 }
 0x36c   :  { %2538 = vmatprep.subr.bf16.mxu1 %v2885_v0 }
 0x36e   :  { %2506 = vmatpush1.bf16.msra.mxu0 %v3194_v44 }
 0x36f   :  { %2508 = vmatprep.subr.bf16.mxu0 %v3201_v53  ;;  %2540 = vmatpush3.bf16.msra.mxu1 %v3216_v55 }
 0x370   :  { %2541 = vmatprep.subr.bf16.mxu1 %v2885_v0 }
 0x372   :  { %2510 = vmatpush1.bf16.msra.mxu0 %v3204_v10 }
 0x373   :  { %2512 = vmatprep.subr.bf16.mxu0 %v3211_v33  ;;  %2543 = vmatpush3.bf16.msra.mxu1 %v3226_v62 }
 0x374   :  { %2544 = vmatprep.subr.bf16.mxu1 %v2885_v0 }
 0x376   :  { %2514 = vmatpush1.bf16.msra.mxu0 %v3214_v51 }
 0x377   :  { %2516 = vmatprep.subr.bf16.mxu0 %v3219_v4  ;;  %2546 = vmatpush3.bf16.msra.mxu1 %v3236_v19 }
 0x378   :  { %2579 = vmatprep.subr.bf16.mxu1 %v2885_v0 }
 0x37a   :  { %2518 = vmatpush1.bf16.msra.mxu0 %v3222_v57 }
 0x37b   :  { %2520 = vmatprep.subr.bf16.mxu0 %v3228_v2 }
 0x37e   :  { %2522 = vmatpush1.bf16.msra.mxu0 %v3232_v14 }
 0x37f   :  { %2548 = vmatprep.subr.bf16.mxu0 %v3174_v11 }
 0x42d   :  { %v837_v23 = vpop.f32.mrb[6].mxu0  ;;  %v908_v46 = vpop.f32.mrb[6].mxu1 }
 0x42e   :  { %v838_v27 = vadd.f32 %v837_v23, %v3063_v25  ;;  %v839_v28 = vpop.f32.mrb[7].mxu0  ;;  %v2126_v32 = vpop.f32.mrb[7].mxu1  ;;  %v909_v56 = vadd.f32 %v908_v46, %v3069_v49 }
 0x42f   :  { %v840_v34 = vadd.f32 %v839_v28, %v3065_v26  ;;  %v1139_v32 = vrot.slane %v941_v13, 2 }
 0x430   :  { %v912_v36 = vadd.f32 %v838_v27, %v722_v37 }
 0x431   :  { %v922_v40 = vadd.f32 %v920_v5, %v840_v34 }
 0x432   :  { %v1841_v39 = vmul.f32 -1.442695, %v912_v36 }
 0x433   :  { %v1842_v43 = vmul.f32 -1.442695, %v922_v40 }
 0x434   :  { %2757 = vpow2.f32 %v1841_v39 }
 0x435   :  { %2759 = vpow2.f32 %v1842_v43 }
 0x43e   :  { %v2758_v45 = vpop.eup %2757 }
 0x43f   :  { %v916_v48 = vadd.f32 1.0, %v2758_v45  ;;  %v2760_v52 = vpop.eup %2759 }
 0x440   :  { %v926_v54 = vadd.f32 1.0, %v2760_v52 }
 0x441   :  { %2761 = vrcp.f32 %v916_v48 }
 0x442   :  { %2763 = vrcp.f32 %v926_v54  ;;  %v1149_v54 = vrot.slane %v941_v13, 4 }
 0x44b   :  { %v2762_v15 = vpop.eup %2761 }
 0x44c   :  { %v929_v21 = vmul.f32 %v2762_v15, %v909_v56  ;;  %v2764_v31 = vpop.eup %2763 }
 0x44d   :  { %v934_v41 = vsub.f32 1.0, %v2764_v31  ;;  %v936_v59 = vmul.f32 %v2764_v31, %v3160_v7  ;;  %v1163_v7 = vld [vmem:[#allocation6 + $0x10] sm:$0xff] }
 0x44e   :  { %v932_v22 = vadd.f32 %v930_v9, %v929_v21  ;;  %v3271_v6 = vpack.c.bf16 %v1166_v63, %v1163_v7 }
 0x450   :  { %2765 = vtanh.f32 %v932_v22 }
 0x45a   :  { %v2766_v42 = vpop.eup %2765 }
 0x45b   :  { %v935_v50 = vmul.f32 %v2766_v42, %v934_v41 }
 0x45d   :  { %v3247_v60 = vadd.f32 %v936_v59, %v935_v50  ;;  %v1160_v59 = vld [vmem:[#allocation3 + $0x1e] sm:$0x3f] }
 0x45e   :  { %v1358_v3 = vrot.slane %v1160_v59, 2 }
 0x45f   :  { %939 = vst [vmem:[#allocation8 + $0x6] sm:$0x3] %v3247_v60  ;;  %1055 = vmatmul.mubr.f32.vlgmr.msra.gmra.mrb[8].mxu0 %v3247_v60  ;;  %2160 = vmatmul.mubr.f32.vlgmr.msra.gmra.mrb[8].mxu1 %v3247_v60 }
 0x460   :  { %2550 = vmatpush1.bf16.msra.mxu0 %v3176_v18  ;;  %1273 = vmatprep.mubr.f32.mxu0 %v2886_v1 }
 0x461   :  { %2552 = vmatprep.subr.bf16.mxu0 %v3180_v20  ;;  %2194 = vmatprep.mubr.msk.f32.mxu1 %vm2887_vm0, %v2886_v1 }
 0x462   :  { %2581 = vmatpush3.bf16.msra.mxu1 %v3271_v6 }
 0x463   :  { %2582 = vmatprep.subr.bf16.mxu1 %v2885_v0 }
 0x464   :  { %2554 = vmatpush1.bf16.msra.mxu0 %v3182_v24 }
 0x465   :  { %2556 = vmatprep.subr.bf16.mxu0 %v3186_v30 }
 0x466   :  { %2584 = vmatpush3.bf16.msra.mxu1 %v3275_v58 }
 0x467   :  { %2585 = vmatprep.subr.bf16.mxu1 %v2885_v0 }
 0x468   :  { %2558 = vmatpush1.bf16.msra.mxu0 %v3188_v35 }
 0x469   :  { %2560 = vmatprep.subr.bf16.mxu0 %v3192_v38 }
 0x46a   :  { %2587 = vmatpush3.bf16.msra.mxu1 %v3279_v8 }
 0x46b   :  { %2588 = vmatprep.subr.bf16.mxu1 %v2885_v0 }
 0x46c   :  { %2562 = vmatpush1.bf16.msra.mxu0 %v3194_v44 }
 0x46d   :  { %2564 = vmatprep.subr.bf16.mxu0 %v3201_v53 }
 0x46e   :  { %2590 = vmatpush3.bf16.msra.mxu1 %v3197_v47 }
 0x46f   :  { %2591 = vmatprep.subr.bf16.mxu1 %v2885_v0 }
 0x470   :  { %2566 = vmatpush1.bf16.msra.mxu0 %v3204_v10 }
 0x471   :  { %2568 = vmatprep.subr.bf16.mxu0 %v3211_v33 }
 0x472   :  { %2593 = vmatpush3.bf16.msra.mxu1 %v3207_v16 }
 0x473   :  { %2594 = vmatprep.subr.bf16.mxu1 %v2885_v0 }
 0x474   :  { %2570 = vmatpush1.bf16.msra.mxu0 %v3214_v51 }
 0x475   :  { %2572 = vmatprep.subr.bf16.mxu0 %v3219_v4 }
 0x476   :  { %2596 = vmatpush3.bf16.msra.mxu1 %v3216_v55 }
 0x477   :  { %2597 = vmatprep.subr.bf16.mxu1 %v2885_v0 }
 0x478   :  { %2574 = vmatpush1.bf16.msra.mxu0 %v3222_v57 }
 0x479   :  { %2576 = vmatprep.subr.bf16.mxu0 %v3228_v2 }
 0x47a   :  { %2599 = vmatpush3.bf16.msra.mxu1 %v3226_v62 }
 0x47b   :  { %2600 = vmatprep.subr.bf16.mxu1 %v2885_v0 }
 0x47c   :  { %2578 = vmatpush1.bf16.msra.mxu0 %v3232_v14 }
 0x47d   :  { %2604 = vmatprep.subr.bf16.mxu0 %v3174_v11 }
 0x47e   :  { %2602 = vmatpush3.bf16.msra.mxu1 %v3236_v19 }
 0x47f   :  { %2635 = vmatprep.subr.bf16.mxu1 %v2885_v0 }
 0x532   :  { %v1056_v29 = vpop.f32.mrb[8].mxu0  ;;  %v1127_v37 = vpop.f32.mrb[8].mxu1 }
 0x533   :  { %v1057_v23 = vadd.f32 %v1056_v29, %v3063_v25  ;;  %v1058_v46 = vpop.f32.mrb[9].mxu0  ;;  %v2161_v27 = vpop.f32.mrb[9].mxu1  ;;  %v1128_v52 = vadd.f32 %v1127_v37, %v3069_v49 }
 0x534   :  { %v1059_v28 = vadd.f32 %v1058_v46, %v3065_v26 }
 0x535   :  { %v1131_v34 = vadd.f32 %v1057_v23, %v941_v13 }
 0x536   :  { %v1141_v36 = vadd.f32 %v1139_v32, %v1059_v28 }
 0x537   :  { %v1843_v5 = vmul.f32 -1.442695, %v1131_v34  ;;  %v1368_v34 = vrot.slane %v1160_v59, 4 }
 0x538   :  { %v1844_v39 = vmul.f32 -1.442695, %v1141_v36 }
 0x539   :  { %2767 = vpow2.f32 %v1843_v5 }
 0x53a   :  { %2769 = vpow2.f32 %v1844_v39 }
 0x543   :  { %v2768_v40 = vpop.eup %2767 }
 0x544   :  { %v1135_v43 = vadd.f32 1.0, %v2768_v40  ;;  %v2770_v45 = vpop.eup %2769 }
 0x545   :  { %v1145_v48 = vadd.f32 1.0, %v2770_v45 }
 0x546   :  { %2771 = vrcp.f32 %v1135_v43 }
 0x547   :  { %2773 = vrcp.f32 %v1145_v48 }
 0x550   :  { %v2772_v56 = vpop.eup %2771 }
 0x551   :  { %v1148_v9 = vmul.f32 %v2772_v56, %v1128_v52  ;;  %v2774_v21 = vpop.eup %2773 }
 0x552   :  { %v1153_v22 = vsub.f32 1.0, %v2774_v21  ;;  %v1155_v42 = vmul.f32 %v2774_v21, %v3247_v60 }
 0x553   :  { %v1151_v15 = vadd.f32 %v1149_v54, %v1148_v9 }
 0x555   :  { %2775 = vtanh.f32 %v1151_v15  ;;  %v1598_v15 = vld [vmem:[#allocation3 + $0x2a] sm:$0x3f] }
 0x55f   :  { %v2776_v31 = vpop.eup %2775 }
 0x560   :  { %v1154_v41 = vmul.f32 %v2776_v31, %v1153_v22 }
 0x562   :  { %v3297_v50 = vadd.f32 %v1155_v42, %v1154_v41 }
 0x564   :  { %1158 = vst [vmem:[#allocation8 + $0x8] sm:$0x3] %v3297_v50  ;;  %1274 = vmatmul.mubr.f32.vlgmr.msra.gmra.mrb[10].mxu0 %v3297_v50  ;;  %2195 = vmatmul.mubr.f32.vlgmr.msra.gmra.mrb[10].mxu1 %v3297_v50 }
 0x565   :  { %2606 = vmatpush1.bf16.msra.mxu0 %v3176_v18  ;;  %2637 = vmatpush3.bf16.msra.mxu1 %v3271_v6 }
 0x566   :  { %2608 = vmatprep.subr.bf16.mxu0 %v3180_v20  ;;  %2638 = vmatprep.subr.bf16.mxu1 %v2885_v0 }
 0x567   :  { %1492 = vmatprep.mubr.f32.mxu0 %v2886_v1  ;;  %2229 = vmatprep.mubr.msk.f32.mxu1 %vm2887_vm0, %v2886_v1 }
 0x569   :  { %2610 = vmatpush1.bf16.msra.mxu0 %v3182_v24  ;;  %2640 = vmatpush3.bf16.msra.mxu1 %v3275_v58 }
 0x56a   :  { %2612 = vmatprep.subr.bf16.mxu0 %v3186_v30  ;;  %2641 = vmatprep.subr.bf16.mxu1 %v2885_v0 }
 0x56d   :  { %2614 = vmatpush1.bf16.msra.mxu0 %v3188_v35  ;;  %2643 = vmatpush3.bf16.msra.mxu1 %v3279_v8 }
 0x56e   :  { %2616 = vmatprep.subr.bf16.mxu0 %v3192_v38  ;;  %2644 = vmatprep.subr.bf16.mxu1 %v2885_v0 }
 0x571   :  { %2618 = vmatpush1.bf16.msra.mxu0 %v3194_v44  ;;  %2646 = vmatpush3.bf16.msra.mxu1 %v3197_v47 }
 0x572   :  { %2620 = vmatprep.subr.bf16.mxu0 %v3201_v53  ;;  %2647 = vmatprep.subr.bf16.mxu1 %v2885_v0 }
 0x575   :  { %2622 = vmatpush1.bf16.msra.mxu0 %v3204_v10  ;;  %2649 = vmatpush3.bf16.msra.mxu1 %v3207_v16 }
 0x576   :  { %2624 = vmatprep.subr.bf16.mxu0 %v3211_v33  ;;  %2650 = vmatprep.subr.bf16.mxu1 %v2885_v0 }
 0x579   :  { %2626 = vmatpush1.bf16.msra.mxu0 %v3214_v51  ;;  %2652 = vmatpush3.bf16.msra.mxu1 %v3216_v55 }
 0x57a   :  { %2628 = vmatprep.subr.bf16.mxu0 %v3219_v4  ;;  %2653 = vmatprep.subr.bf16.mxu1 %v2885_v0 }
 0x57d   :  { %2630 = vmatpush1.bf16.msra.mxu0 %v3222_v57  ;;  %2655 = vmatpush3.bf16.msra.mxu1 %v3226_v62 }
 0x57e   :  { %2632 = vmatprep.subr.bf16.mxu0 %v3228_v2  ;;  %2656 = vmatprep.subr.bf16.mxu1 %v2885_v0 }
 0x581   :  { %2634 = vmatpush1.bf16.msra.mxu0 %v3232_v14  ;;  %2658 = vmatpush3.bf16.msra.mxu1 %v3236_v19 }
 0x582   :  { %2660 = vmatprep.subr.bf16.mxu0 %v3174_v11  ;;  %2691 = vmatprep.subr.bf16.mxu1 %v2885_v0 }
 0x637   :  { %v1275_v60 = vpop.f32.mrb[10].mxu0  ;;  %v1346_v7 = vpop.f32.mrb[10].mxu1 }
 0x638   :  { %v1276_v63 = vadd.f32 %v1275_v60, %v3063_v25  ;;  %v1277_v12 = vpop.f32.mrb[11].mxu0  ;;  %v2196_v17 = vpop.f32.mrb[11].mxu1  ;;  %v1347_v32 = vadd.f32 %v1346_v7, %v3069_v49 }
 0x639   :  { %v1278_v61 = vadd.f32 %v1277_v12, %v3065_v26 }
 0x63a   :  { %v1350_v13 = vadd.f32 %v1276_v63, %v1160_v59  ;;  %v1796_v59 = vrot.slane %v1598_v15, 2 }
 0x63b   :  { %v1360_v37 = vadd.f32 %v1358_v3, %v1278_v61 }
 0x63c   :  { %v1845_v29 = vmul.f32 -1.442695, %v1350_v13 }
 0x63d   :  { %v1846_v23 = vmul.f32 -1.442695, %v1360_v37  ;;  %v1806_v37 = vrot.slane %v1598_v15, 4 }
 0x63e   :  { %2777 = vpow2.f32 %v1845_v29 }
 0x63f   :  { %2779 = vpow2.f32 %v1846_v23 }
 0x648   :  { %v2778_v46 = vpop.eup %2777 }
 0x649   :  { %v1354_v11 = vadd.f32 1.0, %v2778_v46  ;;  %v2780_v27 = vpop.eup %2779 }
 0x64a   :  { %v1364_v28 = vadd.f32 1.0, %v2780_v27 }
 0x64b   :  { %2781 = vrcp.f32 %v1354_v11 }
 0x64c   :  { %2783 = vrcp.f32 %v1364_v28 }
 0x655   :  { %v2782_v5 = vpop.eup %2781 }
 0x656   :  { %v1367_v36 = vmul.f32 %v2782_v5, %v1347_v32  ;;  %v2784_v40 = vpop.eup %2783 }
 0x657   :  { %v1372_v43 = vsub.f32 1.0, %v2784_v40  ;;  %v1374_v52 = vmul.f32 %v2784_v40, %v3297_v50 }
 0x658   :  { %v1370_v39 = vadd.f32 %v1368_v34, %v1367_v36 }
 0x65a   :  { %2785 = vtanh.f32 %v1370_v39 }
 0x664   :  { %v2786_v45 = vpop.eup %2785 }
 0x665   :  { %v1373_v48 = vmul.f32 %v2786_v45, %v1372_v43 }
 0x667   :  { %v3341_v54 = vadd.f32 %v1374_v52, %v1373_v48 }
 0x669   :  { %1377 = vst [vmem:[#allocation8 + $0xa] sm:$0x3] %v3341_v54  ;;  %1493 = vmatmul.mubr.f32.vlgmr.msra.gmra.mrb[12].mxu0 %v3341_v54  ;;  %2230 = vmatmul.mubr.f32.vlgmr.msra.gmra.mrb[12].mxu1 %v3341_v54 }
 0x66a   :  { %2662 = vmatpush1.bf16.msra.mxu0 %v3176_v18  ;;  %2693 = vmatpush3.bf16.msra.mxu1 %v3271_v6 }
 0x66b   :  { %2664 = vmatprep.subr.bf16.mxu0 %v3180_v20  ;;  %2694 = vmatprep.subr.bf16.mxu1 %v2885_v0 }
 0x66c   :  { %1711 = vmatprep.mubr.f32.mxu0 %v2886_v1  ;;  %2264 = vmatprep.mubr.msk.f32.mxu1 %vm2887_vm0, %v2886_v1  ;;  %v1379_v1 = vld [vmem:[#allocation3 + $0x24] sm:$0x3f] }
 0x66e   :  { %2666 = vmatpush1.bf16.msra.mxu0 %v3182_v24  ;;  %2696 = vmatpush3.bf16.msra.mxu1 %v3275_v58 }
 0x66f   :  { %2668 = vmatprep.subr.bf16.mxu0 %v3186_v30  ;;  %2697 = vmatprep.subr.bf16.mxu1 %v2885_v0 }
 0x672   :  { %2670 = vmatpush1.bf16.msra.mxu0 %v3188_v35  ;;  %2699 = vmatpush3.bf16.msra.mxu1 %v3279_v8 }
 0x673   :  { %2672 = vmatprep.subr.bf16.mxu0 %v3192_v38  ;;  %2700 = vmatprep.subr.bf16.mxu1 %v2885_v0 }
 0x676   :  { %2674 = vmatpush1.bf16.msra.mxu0 %v3194_v44  ;;  %2702 = vmatpush3.bf16.msra.mxu1 %v3197_v47  ;;  %v1577_v44 = vrot.slane %v1379_v1, 2 }
 0x677   :  { %2676 = vmatprep.subr.bf16.mxu0 %v3201_v53  ;;  %2703 = vmatprep.subr.bf16.mxu1 %v2885_v0 }
 0x67a   :  { %2678 = vmatpush1.bf16.msra.mxu0 %v3204_v10  ;;  %2705 = vmatpush3.bf16.msra.mxu1 %v3207_v16 }
 0x67b   :  { %2680 = vmatprep.subr.bf16.mxu0 %v3211_v33  ;;  %2706 = vmatprep.subr.bf16.mxu1 %v2885_v0 }
 0x67e   :  { %2682 = vmatpush1.bf16.msra.mxu0 %v3214_v51  ;;  %2708 = vmatpush3.bf16.msra.mxu1 %v3216_v55 }
 0x67f   :  { %2684 = vmatprep.subr.bf16.mxu0 %v3219_v4  ;;  %2709 = vmatprep.subr.bf16.mxu1 %v2885_v0 }
 0x682   :  { %2686 = vmatpush1.bf16.msra.mxu0 %v3222_v57  ;;  %2711 = vmatpush3.bf16.msra.mxu1 %v3226_v62  ;;  %v1587_v57 = vrot.slane %v1379_v1, 4 }
 0x683   :  { %2688 = vmatprep.subr.bf16.mxu0 %v3228_v2  ;;  %2712 = vmatprep.subr.bf16.mxu1 %v2885_v0 }
 0x686   :  { %2690 = vmatpush1.bf16.msra.mxu0 %v3232_v14  ;;  %2714 = vmatpush3.bf16.msra.mxu1 %v3236_v19 }
 0x73c   :  { %v1494_v18 = vpop.f32.mrb[12].mxu0  ;;  %v1565_v20 = vpop.f32.mrb[12].mxu1 }
 0x73d   :  { %v1495_v24 = vadd.f32 %v1494_v18, %v3063_v25  ;;  %v1496_v30 = vpop.f32.mrb[13].mxu0  ;;  %v2231_v35 = vpop.f32.mrb[13].mxu1  ;;  %v1566_v4 = vadd.f32 %v1565_v20, %v3069_v49 }
 0x73e   :  { %v1497_v38 = vadd.f32 %v1496_v30, %v3065_v26 }
 0x73f   :  { %v1569_v47 = vadd.f32 %v1495_v24, %v1379_v1 }
 0x740   :  { %v1579_v10 = vadd.f32 %v1577_v44, %v1497_v38 }
 0x741   :  { %v1847_v53 = vmul.f32 -1.442695, %v1569_v47 }
 0x742   :  { %v1848_v16 = vmul.f32 -1.442695, %v1579_v10 }
 0x743   :  { %2787 = vpow2.f32 %v1847_v53 }
 0x744   :  { %2789 = vpow2.f32 %v1848_v16 }
 0x74d   :  { %v2788_v0 = vpop.eup %2787 }
 0x74e   :  { %v1573_v33 = vadd.f32 1.0, %v2788_v0  ;;  %v2790_v51 = vpop.eup %2789 }
 0x74f   :  { %v1583_v55 = vadd.f32 1.0, %v2790_v51 }
 0x750   :  { %2791 = vrcp.f32 %v1573_v33 }
 0x751   :  { %2793 = vrcp.f32 %v1583_v55 }
 0x75a   :  { %v2792_v62 = vpop.eup %2791 }
 0x75b   :  { %v1586_v2 = vmul.f32 %v2792_v62, %v1566_v4  ;;  %v2794_v19 = vpop.eup %2793 }
 0x75c   :  { %v1591_v6 = vsub.f32 1.0, %v2794_v19  ;;  %v1593_v56 = vmul.f32 %v2794_v19, %v3341_v54 }
 0x75d   :  { %v1589_v14 = vadd.f32 %v1587_v57, %v1586_v2 }
 0x75f   :  { %2795 = vtanh.f32 %v1589_v14 }
 0x769   :  { %v2796_v58 = vpop.eup %2795 }
 0x76a   :  { %v1592_v8 = vmul.f32 %v2796_v58, %v1591_v6 }
 0x76c   :  { %v1594_v9 = vadd.f32 %v1593_v56, %v1592_v8 }
 0x76e   :  { %1596 = vst [vmem:[#allocation8 + $0xc] sm:$0x3] %v1594_v9  ;;  %1712 = vmatmul.mubr.f32.vlgmr.msra.gmra.mrb[14].mxu0 %v1594_v9  ;;  %2265 = vmatmul.mubr.f32.vlgmr.msra.gmra.mrb[14].mxu1 %v1594_v9 }
 0x841   :  { %v1713_v21 = vpop.f32.mrb[14].mxu0  ;;  %v1784_v22 = vpop.f32.mrb[14].mxu1 }
 0x842   :  { %v1714_v31 = vadd.f32 %v1713_v21, %v3063_v25  ;;  %v1715_v41 = vpop.f32.mrb[15].mxu0  ;;  %v2266_v42 = vpop.f32.mrb[15].mxu1  ;;  %v1785_v29 = vadd.f32 %v1784_v22, %v3069_v49 }
 0x843   :  { %v1716_v50 = vadd.f32 %v1715_v41, %v3065_v26 }
 0x844   :  { %v1788_v60 = vadd.f32 %v1714_v31, %v1598_v15 }
 0x845   :  { %v1798_v63 = vadd.f32 %v1796_v59, %v1716_v50 }
 0x846   :  { %v1849_v7 = vmul.f32 -1.442695, %v1788_v60 }
 0x847   :  { %v1850_v12 = vmul.f32 -1.442695, %v1798_v63 }
 0x848   :  { %2797 = vpow2.f32 %v1849_v7 }
 0x849   :  { %2799 = vpow2.f32 %v1850_v12 }
 0x852   :  { %v2798_v17 = vpop.eup %2797 }
 0x853   :  { %v1792_v61 = vadd.f32 1.0, %v2798_v17  ;;  %v2800_v3 = vpop.eup %2799 }
 0x854   :  { %v1802_v13 = vadd.f32 1.0, %v2800_v3 }
 0x855   :  { %2801 = vrcp.f32 %v1792_v61 }
 0x856   :  { %2803 = vrcp.f32 %v1802_v13 }
 0x85f   :  { %v2802_v25 = vpop.eup %2801 }
 0x860   :  { %v1805_v23 = vmul.f32 %v2802_v25, %v1785_v29  ;;  %v2804_v26 = vpop.eup %2803 }
 0x861   :  { %v1810_v11 = vsub.f32 1.0, %v2804_v26  ;;  %v1812_v32 = vmul.f32 %v2804_v26, %v1594_v9 }
 0x862   :  { %v1808_v46 = vadd.f32 %v1806_v37, %v1805_v23 }
 0x864   :  { %2805 = vtanh.f32 %v1808_v46 }
 0x86e   :  { %v2806_v27 = vpop.eup %2805 }
 0x86f   :  { %v1811_v28 = vmul.f32 %v2806_v27, %v1810_v11 }
 0x871   :  { %v1813_v34 = vadd.f32 %v1812_v32, %v1811_v28 }
 0x873   :  { %1815 = vst [vmem:[#allocation8 + $0xe] sm:$0x3] %v1813_v34  ;;  %1816 = vst [vmem:[#allocation2] sm:$0x3] %v1813_v34 }
 0x874   :  { %2862 = shalt.err (!%p2859_p6)
}
 0x875   :  { %s2863_s17 = scalar_lea.hbm %s3401_s3, 256 }
 0x876   :  { %p2864_p7 = scmp.ne.s32.totalorder %s3401_s3, %s2863_s17  ;;  %p2867_p8 = scmp.lt.u32.totalorder %s2863_s17, %s3401_s3 }
 0x878   :  { %p2869_p9 = pnand %p2867_p8, %p2864_p7 }
 0x87a   :  { %2872 = shalt.err (!%p2869_p9)
}
 0x87b   :  { %s2889_s22 = smov 32   ;;  %s2890_s23 = smov 2  }
 0x87c   :  { %1828 = dma.vmem_to_hbm [thread:$0]  %s1823_s13, 256, %s3401_s3, [#allocation5], %s2889_s22, %s2889_s22, %s2890_s23  }
 0x87d   :  { %2877 = dma.done.wait [#allocation5], 256  }
 0x87e   :  { %2878 = vsyncadd [#allocation5], 4294967040 }
 0x87f   :  { %1832 = vsyncpa [#allocation4], 1 }
 0x880   :  { %1833 = vsyncpa [#allocation7], 1 }
 0x881   :  { %1834 = vsyncpa [#allocation5], 1 }

</bundles_post_ra>
